<compile_context>
chip_gen: v7x
topology: tpu7x:2x2x1
jax: 0.10.0
libtpu: 0.0.40
codegen_flags: <defaults>
</compile_context>

<pallas_src>
import functools

import jax
import jax.numpy as jnp
import numpy as np
from jax.experimental import pallas as pl
from jax.experimental.pallas import tpu as pltpu


def _round_up(x, m):
    return ((x + m - 1) // m) * m


# --------------------------------------------------------------------------- #
# Kernel A: conv tile (single deep-K bf16 matmul, f32 acc) + partial BN stats
# --------------------------------------------------------------------------- #
def _conv_stats_kernel(p_ref, w_ref, conv_ref, stats_ref):
    # p_ref: (TM, Kp) bf16, w_ref: (Kp, Cp) bf16
    acc = jnp.dot(p_ref[...], w_ref[...], preferred_element_type=jnp.float32)  # (TM, Cp) f32
    conv_ref[...] = acc
    s = jnp.sum(acc, axis=0, keepdims=True)            # (1, Cp)
    ss = jnp.sum(acc * acc, axis=0, keepdims=True)     # (1, Cp)
    stats_ref[...] = jnp.concatenate([s, ss], axis=0)[None]   # (1, 2, Cp)


# --------------------------------------------------------------------------- #
# Kernel B: apply BN (per-channel affine) [+ residual] [+ relu]
# --------------------------------------------------------------------------- #
def _make_bn_apply_kernel(apply_relu, has_residual):
    def kernel(*refs):
        if has_residual:
            y_ref, scale_ref, shift_ref, res_ref, out_ref = refs
        else:
            y_ref, scale_ref, shift_ref, out_ref = refs
        y = y_ref[...] * scale_ref[...] + shift_ref[...]
        if has_residual:
            y = y + res_ref[...]
        if apply_relu:
            y = jnp.maximum(y, 0.0)
        out_ref[...] = y.astype(out_ref.dtype)
    return kernel


# --------------------------------------------------------------------------- #
# ConvBn2d wrapper
# --------------------------------------------------------------------------- #
def conv_bn_2d(x_nhwc, w_hwio, gamma, beta, *, padding, stride, eps=1e-5,
               apply_relu=False, residual=None, tile_m=256):
    """x_nhwc: (N,H,W,Cin) f32; w_hwio: (KH,KW,Cin,Cout). Returns (N,Ho,Wo,Cout) f32."""
    N, H, W, Cin = x_nhwc.shape
    KH, KW, _, Cout = w_hwio.shape
    Ho = (H + 2 * padding - KH) // stride + 1
    Wo = (W + 2 * padding - KW) // stride + 1
    M = N * Ho * Wo
    K = KH * KW * Cin

    # Lane-dense, tile-friendly padded sizes.
    Cp = _round_up(Cout, 128)                 # output / channel lanes
    Kp = _round_up(K, 128)                    # contraction depth
    tm = min(tile_m, _round_up(M, 16))        # row tile (multiple of 16 for bf16 sublanes)
    Mp = _round_up(M, tm)
    n_tiles = Mp // tm

    # ---- glue: pad + im2col (patch columns ordered (kh, kw, cin) = weight.reshape order)
    xp = jnp.pad(x_nhwc, ((0, 0), (padding, padding), (padding, padding), (0, 0)))
    patches = jnp.concatenate(
        [
            xp[:, kh:kh + stride * Ho:stride, kw:kw + stride * Wo:stride, :].reshape(M, Cin)
            for kh in range(KH)
            for kw in range(KW)
        ],
        axis=1,
    )                                                            # (M, K) f32
    patches = jnp.pad(patches, ((0, Mp - M), (0, Kp - K))).astype(jnp.bfloat16)
    w = jnp.pad(w_hwio.reshape(K, Cout).astype(jnp.float32),
                ((0, Kp - K), (0, Cp - Cout))).astype(jnp.bfloat16)

    # ---- pass 1: conv + per-tile partial stats
    cost = pl.CostEstimate(
        flops=2 * Mp * Kp * Cp,
        transcendentals=0,
        bytes_accessed=patches.size * 2 + w.size * 2 + Mp * Cp * 4 + n_tiles * 2 * Cp * 4,
    )
    conv_out, part_stats = pl.pallas_call(
        _conv_stats_kernel,
        out_shape=(jax.ShapeDtypeStruct((Mp, Cp), jnp.float32),
                   jax.ShapeDtypeStruct((n_tiles, 2, Cp), jnp.float32)),
        grid=(n_tiles,),
        in_specs=[pl.BlockSpec((tm, Kp), lambda i: (i, 0)),
                  pl.BlockSpec((Kp, Cp), lambda i: (0, 0))],
        out_specs=(pl.BlockSpec((tm, Cp), lambda i: (i, 0)),
                   pl.BlockSpec((1, 2, Cp), lambda i: (i, 0, 0))),
        compiler_params=pltpu.CompilerParams(dimension_semantics=("parallel",)),
        cost_estimate=cost,
    )(patches, w)

    # ---- finalize BN statistics (tiny, per-channel; divide by the REAL row count M)
    ssum = jnp.sum(part_stats[:, 0, :], axis=0)                  # (Cp,)
    ssq = jnp.sum(part_stats[:, 1, :], axis=0)                   # (Cp,)
    mean = ssum / M
    var = jnp.maximum(ssq / M - mean * mean, 0.0)                # biased variance
    gamma_p = jnp.pad(gamma.astype(jnp.float32), (0, Cp - Cout))
    beta_p = jnp.pad(beta.astype(jnp.float32), (0, Cp - Cout))
    scale = gamma_p * jax.lax.rsqrt(var + eps)
    shift = beta_p - mean * scale

    # ---- pass 2: apply BN affine (+ residual) (+ relu)
    has_res = residual is not None
    inputs = [conv_out, scale.reshape(1, Cp), shift.reshape(1, Cp)]
    in_specs = [pl.BlockSpec((tm, Cp), lambda i: (i, 0)),
                pl.BlockSpec((1, Cp), lambda i: (0, 0)),
                pl.BlockSpec((1, Cp), lambda i: (0, 0))]
    if has_res:
        res = residual.reshape(M, Cout).astype(jnp.float32)
        res = jnp.pad(res, ((0, Mp - M), (0, Cp - Cout)))
        inputs.append(res)
        in_specs.append(pl.BlockSpec((tm, Cp), lambda i: (i, 0)))

    out = pl.pallas_call(
        _make_bn_apply_kernel(apply_relu, has_res),
        out_shape=jax.ShapeDtypeStruct((Mp, Cp), jnp.float32),
        grid=(n_tiles,),
        in_specs=in_specs,
        out_specs=pl.BlockSpec((tm, Cp), lambda i: (i, 0)),
        compiler_params=pltpu.CompilerParams(dimension_semantics=("parallel",)),
    )(*inputs)

    return out[:M, :Cout].reshape(N, Ho, Wo, Cout)


# --------------------------------------------------------------------------- #
# BasicBlock forward (NCHW in / NCHW out, like the PyTorch module)
# --------------------------------------------------------------------------- #
def basic_block_forward(x_nchw, params, *, stride=1, is_shortcut=False):
    x = jnp.transpose(x_nchw, (0, 2, 3, 1))  # -> NHWC (kept through the whole block)
    z = conv_bn_2d(x, params["w1"], params["g1"], params["b1"],
                   padding=1, stride=stride, apply_relu=True)
    if is_shortcut:
        sc = conv_bn_2d(x, params["ws"], params["gs"], params["bs"],
                        padding=0, stride=stride)
    else:
        assert stride == 1 and x.shape[-1] == params["w2"].shape[-1], (
            "identity shortcut requires stride == 1 and in_channel == out_channel")
        sc = x
    # conv_bn2 with residual add + final relu fused into the BN-apply kernel
    z = conv_bn_2d(z, params["w2"], params["g2"], params["b2"],
                   padding=1, stride=1, apply_relu=True, residual=sc)
    return jnp.transpose(z, (0, 3, 1, 2))  # -> NCHW


# --------------------------------------------------------------------------- #
# Pure-JAX f32 reference (for correctness check)
# --------------------------------------------------------------------------- #
def _conv_bn_ref(x_nhwc, w_hwio, gamma, beta, padding, stride, eps=1e-5):
    y = jax.lax.conv_general_dilated(
        x_nhwc, w_hwio, window_strides=(stride, stride),
        padding=[(padding, padding), (padding, padding)],
        dimension_numbers=("NHWC", "HWIO", "NHWC"),
        precision=jax.lax.Precision.HIGHEST)
    mean = jnp.mean(y, axis=(0, 1, 2), keepdims=True)
    var = jnp.mean((y - mean) ** 2, axis=(0, 1, 2), keepdims=True)
    return (y - mean) * (gamma / jnp.sqrt(var + eps)) + beta


def basic_block_ref(x_nchw, p, *, stride=1, is_shortcut=False):
    x = jnp.transpose(x_nchw, (0, 2, 3, 1))
    z = jax.nn.relu(_conv_bn_ref(x, p["w1"], p["g1"], p["b1"], 1, stride))
    z = _conv_bn_ref(z, p["w2"], p["g2"], p["b2"], 1, 1)
    sc = _conv_bn_ref(x, p["ws"], p["gs"], p["bs"], 0, stride) if is_shortcut else x
    z = jax.nn.relu(z + sc)
    return jnp.transpose(z, (0, 3, 1, 2))


# --------------------------------------------------------------------------- #
if __name__ == "__main__":
    # Small shapes consistent with BasicBlock(4, 8, 8, stride=1, is_shortcut=True)
    N, Cin, H, W = 2, 4, 16, 16
    C_mid, Cout = 8, 8
    stride, is_shortcut = 1, True

    key = jax.random.PRNGKey(0)
    ks = jax.random.split(key, 8)
    params = {
        # conv weights in HWIO layout (deterministic synthetic init)
        "w1": 0.2 * jax.random.normal(ks[0], (3, 3, Cin, C_mid), jnp.float32),
        "w2": 0.2 * jax.random.normal(ks[1], (3, 3, C_mid, Cout), jnp.float32),
        "ws": 0.2 * jax.random.normal(ks[2], (1, 1, Cin, Cout), jnp.float32),
        # batch-norm affine params
        "g1": 1.0 + 0.1 * jax.random.normal(ks[3], (C_mid,), jnp.float32),
        "b1": 0.1 * jax.random.normal(ks[4], (C_mid,), jnp.float32),
        "g2": 1.0 + 0.1 * jax.random.normal(ks[5], (Cout,), jnp.float32),
        "b2": 0.1 * jax.random.normal(ks[6], (Cout,), jnp.float32),
        "gs": jnp.ones((Cout,), jnp.float32),
        "bs": jnp.zeros((Cout,), jnp.float32),
    }
    x = jax.random.normal(ks[7], (N, Cin, H, W), jnp.float32)

    fwd = jax.jit(functools.partial(basic_block_forward,
                                    stride=stride, is_shortcut=is_shortcut))
    out = jax.block_until_ready(fwd(x, params))
    ref = jax.block_until_ready(
        basic_block_ref(x, params, stride=stride, is_shortcut=is_shortcut))

    assert out.shape == (N, Cout, H // stride, W // stride), out.shape
    # bf16 MXU operands (f32 accumulation / BN) vs f32-HIGHEST reference
    np.testing.assert_allclose(np.asarray(out), np.asarray(ref), rtol=2e-2, atol=2e-2)
    print("KERNEL_OK")
</pallas_src>

<mosaic_0001>
module attributes {stable_mosaic.version = 11 : i64} {
  func.func @_conv_stats_kernel(%arg0: i32, %arg1: memref<256x128xbf16, #tpu.memory_space<vmem>>, %arg2: memref<128x128xbf16, #tpu.memory_space<vmem>>, %arg3: memref<256x128xf32, #tpu.memory_space<vmem>>, %arg4: memref<1x2x128xf32, #tpu.memory_space<vmem>>) attributes {dimension_semantics = [#tpu.dimension_semantics<parallel>], iteration_bounds = array<i64: 2>, scalar_prefetch = 0 : i64, scratch_operands = 0 : i64, tpu.core_type = #tpu.core_type<tc>, window_params = [{transform_indices = @transform_0, window_bounds = array<i64: 256, 128>}, {pipeline_mode = #tpu.pipeline_mode<synchronous>, transform_indices = @transform_1, window_bounds = array<i64: 128, 128>}, {transform_indices = @transform_2, window_bounds = array<i64: 256, 128>}, {transform_indices = @transform_3, window_bounds = array<i64: 1, 2, 128>}]} {
    %c0 = arith.constant 0 : index
    %c0_0 = arith.constant 0 : index
    %0 = vector.load %arg1[%c0, %c0_0] : memref<256x128xbf16, #tpu.memory_space<vmem>>, vector<256x128xbf16>
    %c0_1 = arith.constant 0 : index
    %c0_2 = arith.constant 0 : index
    %1 = vector.load %arg2[%c0_1, %c0_2] : memref<128x128xbf16, #tpu.memory_space<vmem>>, vector<128x128xbf16>
    %cst = arith.constant dense<0.000000e+00> : vector<256x128xf32>
    %2 = tpu.matmul %0, %1, %cst {dimension_numbers = #tpu.dot_dimension_numbers<[1], [0], [0], [1], [0, 0, 1, 1], [], []>} : vector<256x128xbf16>, vector<128x128xbf16>, vector<256x128xf32> -> vector<256x128xf32>
    %c0_3 = arith.constant 0 : index
    %c0_4 = arith.constant 0 : index
    %3 = vector.load %arg3[%c0_3, %c0_4] : memref<256x128xf32, #tpu.memory_space<vmem>>, vector<256x128xf32>
    tpu.vector_store %arg3[%c0_3, %c0_4], %2 {strides = array<i32>} : memref<256x128xf32, #tpu.memory_space<vmem>>, vector<256x128xf32>,
    %cst_5 = arith.constant dense<0.000000e+00> : vector<128xf32>
    %4 = vector.multi_reduction <add>, %2, %cst_5 [0] : vector<256x128xf32> to vector<128xf32>
    %5 = vector.shape_cast %4 : vector<128xf32> to vector<1x128xf32>
    %6 = arith.mulf %2, %2 : vector<256x128xf32>
    %cst_6 = arith.constant dense<0.000000e+00> : vector<128xf32>
    %7 = vector.multi_reduction <add>, %6, %cst_6 [0] : vector<256x128xf32> to vector<128xf32>
    %8 = vector.shape_cast %7 : vector<128xf32> to vector<1x128xf32>
    %9 = tpu.concatenate %5, %8 in 0 : vector<1x128xf32>, vector<1x128xf32> -> vector<2x128xf32>
    %10 = vector.shape_cast %9 : vector<2x128xf32> to vector<1x2x128xf32>
    %c0_7 = arith.constant 0 : index
    %c0_8 = arith.constant 0 : index
    %c0_9 = arith.constant 0 : index
    %11 = vector.load %arg4[%c0_7, %c0_8, %c0_9] : memref<1x2x128xf32, #tpu.memory_space<vmem>>, vector<1x2x128xf32>
    tpu.vector_store %arg4[%c0_7, %c0_8, %c0_9], %10 {strides = array<i32>} : memref<1x2x128xf32, #tpu.memory_space<vmem>>, vector<1x2x128xf32>,
    return
  }
  func.func @transform_0(%arg0: i32) -> (i32, i32) {
    %c0_i32 = arith.constant 0 : i32
    %c0_i32_0 = arith.constant 0 : i32
    return %arg0, %c0_i32 : i32, i32
  }
  func.func @transform_1(%arg0: i32) -> (i32, i32) {
    %c0_i32 = arith.constant 0 : i32
    %c0_i32_0 = arith.constant 0 : i32
    %c0_i32_1 = arith.constant 0 : i32
    return %c0_i32, %c0_i32_0 : i32, i32
  }
  func.func @transform_2(%arg0: i32) -> (i32, i32) {
    %c0_i32 = arith.constant 0 : i32
    %c0_i32_0 = arith.constant 0 : i32
    return %arg0, %c0_i32 : i32, i32
  }
  func.func @transform_3(%arg0: i32) -> (i32, i32, i32) {
    %c0_i32 = arith.constant 0 : i32
    %c0_i32_0 = arith.constant 0 : i32
    %c0_i32_1 = arith.constant 0 : i32
    return %arg0, %c0_i32, %c0_i32_0 : i32, i32, i32
  }
}

module attributes {stable_mosaic.version = 11 : i64} {
  func.func @kernel(%arg0: i32, %arg1: memref<256x128xf32, #tpu.memory_space<vmem>>, %arg2: memref<1x128xf32, #tpu.memory_space<vmem>>, %arg3: memref<1x128xf32, #tpu.memory_space<vmem>>, %arg4: memref<256x128xf32, #tpu.memory_space<vmem>>) attributes {dimension_semantics = [#tpu.dimension_semantics<parallel>], iteration_bounds = array<i64: 2>, scalar_prefetch = 0 : i64, scratch_operands = 0 : i64, tpu.core_type = #tpu.core_type<tc>, window_params = [{transform_indices = @transform_0, window_bounds = array<i64: 256, 128>}, {pipeline_mode = #tpu.pipeline_mode<synchronous>, transform_indices = @transform_1, window_bounds = array<i64: 1, 128>}, {pipeline_mode = #tpu.pipeline_mode<synchronous>, transform_indices = @transform_2, window_bounds = array<i64: 1, 128>}, {transform_indices = @transform_3, window_bounds = array<i64: 256, 128>}]} {
    %c0 = arith.constant 0 : index
    %c0_0 = arith.constant 0 : index
    %0 = vector.load %arg1[%c0, %c0_0] : memref<256x128xf32, #tpu.memory_space<vmem>>, vector<256x128xf32>
    %c0_1 = arith.constant 0 : index
    %c0_2 = arith.constant 0 : index
    %1 = vector.load %arg2[%c0_1, %c0_2] : memref<1x128xf32, #tpu.memory_space<vmem>>, vector<1x128xf32>
    %2 = vector.broadcast %1 : vector<1x128xf32> to vector<256x128xf32>
    %3 = arith.mulf %0, %2 : vector<256x128xf32>
    %c0_3 = arith.constant 0 : index
    %c0_4 = arith.constant 0 : index
    %4 = vector.load %arg3[%c0_3, %c0_4] : memref<1x128xf32, #tpu.memory_space<vmem>>, vector<1x128xf32>
    %5 = vector.broadcast %4 : vector<1x128xf32> to vector<256x128xf32>
    %6 = arith.addf %3, %5 : vector<256x128xf32>
    %cst = arith.constant 0.000000e+00 : f32
    %7 = vector.broadcast %cst : f32 to vector<256x128xf32>
    %8 = arith.maximumf %6, %7 : vector<256x128xf32>
    %c0_5 = arith.constant 0 : index
    %c0_6 = arith.constant 0 : index
    %9 = vector.load %arg4[%c0_5, %c0_6] : memref<256x128xf32, #tpu.memory_space<vmem>>, vector<256x128xf32>
    tpu.vector_store %arg4[%c0_5, %c0_6], %8 {strides = array<i32>} : memref<256x128xf32, #tpu.memory_space<vmem>>, vector<256x128xf32>,
    return
  }
  func.func @transform_0(%arg0: i32) -> (i32, i32) {
    %c0_i32 = arith.constant 0 : i32
    %c0_i32_0 = arith.constant 0 : i32
    return %arg0, %c0_i32 : i32, i32
  }
  func.func @transform_1(%arg0: i32) -> (i32, i32) {
    %c0_i32 = arith.constant 0 : i32
    %c0_i32_0 = arith.constant 0 : i32
    %c0_i32_1 = arith.constant 0 : i32
    return %c0_i32, %c0_i32_0 : i32, i32
  }
  func.func @transform_2(%arg0: i32) -> (i32, i32) {
    %c0_i32 = arith.constant 0 : i32
    %c0_i32_0 = arith.constant 0 : i32
    %c0_i32_1 = arith.constant 0 : i32
    return %c0_i32, %c0_i32_0 : i32, i32
  }
  func.func @transform_3(%arg0: i32) -> (i32, i32) {
    %c0_i32 = arith.constant 0 : i32
    %c0_i32_0 = arith.constant 0 : i32
    return %arg0, %c0_i32 : i32, i32
  }
}

module attributes {stable_mosaic.version = 11 : i64} {
  func.func @kernel(%arg0: i32, %arg1: memref<256x128xf32, #tpu.memory_space<vmem>>, %arg2: memref<1x128xf32, #tpu.memory_space<vmem>>, %arg3: memref<1x128xf32, #tpu.memory_space<vmem>>, %arg4: memref<256x128xf32, #tpu.memory_space<vmem>>) attributes {dimension_semantics = [#tpu.dimension_semantics<parallel>], iteration_bounds = array<i64: 2>, scalar_prefetch = 0 : i64, scratch_operands = 0 : i64, tpu.core_type = #tpu.core_type<tc>, window_params = [{transform_indices = @transform_0, window_bounds = array<i64: 256, 128>}, {pipeline_mode = #tpu.pipeline_mode<synchronous>, transform_indices = @transform_1, window_bounds = array<i64: 1, 128>}, {pipeline_mode = #tpu.pipeline_mode<synchronous>, transform_indices = @transform_2, window_bounds = array<i64: 1, 128>}, {transform_indices = @transform_3, window_bounds = array<i64: 256, 128>}]} {
    %c0 = arith.constant 0 : index
    %c0_0 = arith.constant 0 : index
    %0 = vector.load %arg1[%c0, %c0_0] : memref<256x128xf32, #tpu.memory_space<vmem>>, vector<256x128xf32>
    %c0_1 = arith.constant 0 : index
    %c0_2 = arith.constant 0 : index
    %1 = vector.load %arg2[%c0_1, %c0_2] : memref<1x128xf32, #tpu.memory_space<vmem>>, vector<1x128xf32>
    %2 = vector.broadcast %1 : vector<1x128xf32> to vector<256x128xf32>
    %3 = arith.mulf %0, %2 : vector<256x128xf32>
    %c0_3 = arith.constant 0 : index
    %c0_4 = arith.constant 0 : index
    %4 = vector.load %arg3[%c0_3, %c0_4] : memref<1x128xf32, #tpu.memory_space<vmem>>, vector<1x128xf32>
    %5 = vector.broadcast %4 : vector<1x128xf32> to vector<256x128xf32>
    %6 = arith.addf %3, %5 : vector<256x128xf32>
    %c0_5 = arith.constant 0 : index
    %c0_6 = arith.constant 0 : index
    %7 = vector.load %arg4[%c0_5, %c0_6] : memref<256x128xf32, #tpu.memory_space<vmem>>, vector<256x128xf32>
    tpu.vector_store %arg4[%c0_5, %c0_6], %6 {strides = array<i32>} : memref<256x128xf32, #tpu.memory_space<vmem>>, vector<256x128xf32>,
    return
  }
  func.func @transform_0(%arg0: i32) -> (i32, i32) {
    %c0_i32 = arith.constant 0 : i32
    %c0_i32_0 = arith.constant 0 : i32
    return %arg0, %c0_i32 : i32, i32
  }
  func.func @transform_1(%arg0: i32) -> (i32, i32) {
    %c0_i32 = arith.constant 0 : i32
    %c0_i32_0 = arith.constant 0 : i32
    %c0_i32_1 = arith.constant 0 : i32
    return %c0_i32, %c0_i32_0 : i32, i32
  }
  func.func @transform_2(%arg0: i32) -> (i32, i32) {
    %c0_i32 = arith.constant 0 : i32
    %c0_i32_0 = arith.constant 0 : i32
    %c0_i32_1 = arith.constant 0 : i32
    return %c0_i32, %c0_i32_0 : i32, i32
  }
  func.func @transform_3(%arg0: i32) -> (i32, i32) {
    %c0_i32 = arith.constant 0 : i32
    %c0_i32_0 = arith.constant 0 : i32
    return %arg0, %c0_i32 : i32, i32
  }
}

module attributes {stable_mosaic.version = 11 : i64} {
  func.func @kernel(%arg0: i32, %arg1: memref<256x128xf32, #tpu.memory_space<vmem>>, %arg2: memref<1x128xf32, #tpu.memory_space<vmem>>, %arg3: memref<1x128xf32, #tpu.memory_space<vmem>>, %arg4: memref<256x128xf32, #tpu.memory_space<vmem>>, %arg5: memref<256x128xf32, #tpu.memory_space<vmem>>) attributes {dimension_semantics = [#tpu.dimension_semantics<parallel>], iteration_bounds = array<i64: 2>, scalar_prefetch = 0 : i64, scratch_operands = 0 : i64, tpu.core_type = #tpu.core_type<tc>, window_params = [{transform_indices = @transform_0, window_bounds = array<i64: 256, 128>}, {pipeline_mode = #tpu.pipeline_mode<synchronous>, transform_indices = @transform_1, window_bounds = array<i64: 1, 128>}, {pipeline_mode = #tpu.pipeline_mode<synchronous>, transform_indices = @transform_2, window_bounds = array<i64: 1, 128>}, {transform_indices = @transform_3, window_bounds = array<i64: 256, 128>}, {transform_indices = @transform_4, window_bounds = array<i64: 256, 128>}]} {
    %c0 = arith.constant 0 : index
    %c0_0 = arith.constant 0 : index
    %0 = vector.load %arg1[%c0, %c0_0] : memref<256x128xf32, #tpu.memory_space<vmem>>, vector<256x128xf32>
    %c0_1 = arith.constant 0 : index
    %c0_2 = arith.constant 0 : index
    %1 = vector.load %arg2[%c0_1, %c0_2] : memref<1x128xf32, #tpu.memory_space<vmem>>, vector<1x128xf32>
    %2 = vector.broadcast %1 : vector<1x128xf32> to vector<256x128xf32>
    %3 = arith.mulf %0, %2 : vector<256x128xf32>
    %c0_3 = arith.constant 0 : index
    %c0_4 = arith.constant 0 : index
    %4 = vector.load %arg3[%c0_3, %c0_4] : memref<1x128xf32, #tpu.memory_space<vmem>>, vector<1x128xf32>
    %5 = vector.broadcast %4 : vector<1x128xf32> to vector<256x128xf32>
    %6 = arith.addf %3, %5 : vector<256x128xf32>
    %c0_5 = arith.constant 0 : index
    %c0_6 = arith.constant 0 : index
    %7 = vector.load %arg4[%c0_5, %c0_6] : memref<256x128xf32, #tpu.memory_space<vmem>>, vector<256x128xf32>
    %8 = arith.addf %6, %7 : vector<256x128xf32>
    %cst = arith.constant 0.000000e+00 : f32
    %9 = vector.broadcast %cst : f32 to vector<256x128xf32>
    %10 = arith.maximumf %8, %9 : vector<256x128xf32>
    %c0_7 = arith.constant 0 : index
    %c0_8 = arith.constant 0 : index
    %11 = vector.load %arg5[%c0_7, %c0_8] : memref<256x128xf32, #tpu.memory_space<vmem>>, vector<256x128xf32>
    tpu.vector_store %arg5[%c0_7, %c0_8], %10 {strides = array<i32>} : memref<256x128xf32, #tpu.memory_space<vmem>>, vector<256x128xf32>,
    return
  }
  func.func @transform_0(%arg0: i32) -> (i32, i32) {
    %c0_i32 = arith.constant 0 : i32
    %c0_i32_0 = arith.constant 0 : i32
    return %arg0, %c0_i32 : i32, i32
  }
  func.func @transform_1(%arg0: i32) -> (i32, i32) {
    %c0_i32 = arith.constant 0 : i32
    %c0_i32_0 = arith.constant 0 : i32
    %c0_i32_1 = arith.constant 0 : i32
    return %c0_i32, %c0_i32_0 : i32, i32
  }
  func.func @transform_2(%arg0: i32) -> (i32, i32) {
    %c0_i32 = arith.constant 0 : i32
    %c0_i32_0 = arith.constant 0 : i32
    %c0_i32_1 = arith.constant 0 : i32
    return %c0_i32, %c0_i32_0 : i32, i32
  }
  func.func @transform_3(%arg0: i32) -> (i32, i32) {
    %c0_i32 = arith.constant 0 : i32
    %c0_i32_0 = arith.constant 0 : i32
    return %arg0, %c0_i32 : i32, i32
  }
  func.func @transform_4(%arg0: i32) -> (i32, i32) {
    %c0_i32 = arith.constant 0 : i32
    %c0_i32_0 = arith.constant 0 : i32
    return %arg0, %c0_i32 : i32, i32
  }
}

</mosaic_0001>

<bundles_post_ra>
// kernel: basic_block_forward.7
= control target key start
LH: loop header
LB: loop body
LE: loop exit
PB: predicated region body
PF: predicated region fallthrough
CT: control target
= control target key end

     0   :  { %s453_s12 = smov 0   ;;  %s612_s0 = inlined_call_operand.vmem [shape: f32[512,128], index: 0, kind: input, shape index: {}]   ;;  %s613_s1 = inlined_call_operand.vmem [shape: f32[1,128], index: 1, kind: input, shape index: {}]   ;;  %s614_s2 = inlined_call_operand.vmem [shape: f32[1,128], index: 2, kind: input, shape index: {}]   ;;  %s615_s3 = inlined_call_operand.vmem [shape: f32[512,128], index: 3, kind: output, shape index: {}]  }
   0x1 LB: > { %s404_s13 = sadd.s32 4294967295, %s431_s12   ;;  %p408_p0 = scmp.ge.s32.totalorder %s431_s12, 1  ;;  %s431_s12 = sphi %s453_s12, %s13_s12  }
   0x2   : > { %p138_p1 = scmp.lt.s32.totalorder %s431_s12, 3 }
   0x4   : > { %p139_p2 = pnand %p408_p0, %p138_p1 }
   0x5   : > { %s409_s14 = sshll.u32 (!%p139_p2), %s404_s13, 5  ;;  %v464_v0 = vld [vmem:[%s613_s1] ss:$0 sm:$0xff] (!%p139_p2) }
   0x6   : > { %142 = sbr.rel (%p139_p2) target bundleno = 46 (0x2e), region = 32  ;;  %p163_p3 = scmp.lt.s32.totalorder (!%p139_p2), %s409_s14, 63  ;;  %v474_v1 = vld [vmem:[%s614_s2] ss:$0 sm:$0xff] (!%p139_p2) }
   0xd   : > { %s617_s14 = smov (!%p163_p3, %s409_s14), 63 }
   0xe   : > { %s410_s15 = sshll.u32 %s617_s14, 3 }
   0xf   : > { %s469_s20 = scalar_lea.vmem %s612_s0, %s410_s15  ;;  %s497_s25 = scalar_lea.vmem %s615_s3, %s410_s15 }
  0x10   : > { %v174_v2 = vld [vmem:[%s469_s20] sm:$0xff]  ;;  %v175_v3 = vld [vmem:[%s469_s20 + $0x8] sm:$0xff]  ;;  %v176_v4 = vld [vmem:[%s469_s20 + $0x10] sm:$0xff] }
  0x11   : > { %v213_v5 = vmul.f32 %v464_v0, %v174_v2  ;;  %v214_v6 = vmul.f32 %v464_v0, %v175_v3  ;;  %v215_v7 = vmul.f32 %v464_v0, %v176_v4  ;;  %v177_v8 = vld [vmem:[%s469_s20 + $0x18] sm:$0xff]  ;;  %v178_v9 = vld [vmem:[%s469_s20 + $0x20] sm:$0xff]  ;;  %v179_v10 = vld [vmem:[%s469_s20 + $0x28] sm:$0xff] }
  0x12   : > { %v216_v11 = vmul.f32 %v464_v0, %v177_v8  ;;  %v217_v12 = vmul.f32 %v464_v0, %v178_v9  ;;  %v218_v13 = vmul.f32 %v464_v0, %v179_v10  ;;  %v180_v14 = vld [vmem:[%s469_s20 + $0x30] sm:$0xff]  ;;  %v181_v15 = vld [vmem:[%s469_s20 + $0x38] sm:$0xff]  ;;  %v182_v24 = vld [vmem:[%s469_s20 + $0x40] sm:$0xff] }
  0x13   : > { %v252_v16 = vadd.f32 %v474_v1, %v213_v5  ;;  %v253_v17 = vadd.f32 %v474_v1, %v214_v6  ;;  %v254_v18 = vadd.f32 %v474_v1, %v215_v7  ;;  %v219_v19 = vmul.f32 %v464_v0, %v180_v14  ;;  %v183_v25 = vld [vmem:[%s469_s20 + $0x48] sm:$0xff]  ;;  %v184_v26 = vld [vmem:[%s469_s20 + $0x50] sm:$0xff]  ;;  %v185_v31 = vld [vmem:[%s469_s20 + $0x58] sm:$0xff] }
  0x14   : > { %v255_v20 = vadd.f32 %v474_v1, %v216_v11  ;;  %v256_v21 = vadd.f32 %v474_v1, %v217_v12  ;;  %v257_v22 = vadd.f32 %v474_v1, %v218_v13  ;;  %v220_v23 = vmul.f32 %v464_v0, %v181_v15  ;;  %v186_v32 = vld [vmem:[%s469_s20 + $0x60] sm:$0xff]  ;;  %v187_v33 = vld [vmem:[%s469_s20 + $0x68] sm:$0xff]  ;;  %v188_v38 = vld [vmem:[%s469_s20 + $0x70] sm:$0xff] }
  0x15   : > { %v284_v27 = vmax.f32 %v252_v16, 0.0  ;;  %v285_v28 = vmax.f32 %v253_v17, 0.0  ;;  %v286_v29 = vmax.f32 %v254_v18, 0.0  ;;  %v258_v30 = vadd.f32 %v474_v1, %v219_v19  ;;  %v189_v43 = vld [vmem:[%s469_s20 + $0x78] sm:$0xff]  ;;  %v190_v56 = vld [vmem:[%s469_s20 + $0x80] sm:$0xff]  ;;  %v191_v57 = vld [vmem:[%s469_s20 + $0x88] sm:$0xff] }
  0x16   : > { %v287_v34 = vmax.f32 %v255_v20, 0.0  ;;  %v288_v35 = vmax.f32 %v256_v21, 0.0  ;;  %v289_v36 = vmax.f32 %v257_v22, 0.0  ;;  %v259_v37 = vadd.f32 %v474_v1, %v220_v23  ;;  %v192_v58 = vld [vmem:[%s469_s20 + $0x90] sm:$0xff]  ;;  %v193_v63 = vld [vmem:[%s469_s20 + $0x98] sm:$0xff]  ;;  %v194_v2 = vld [vmem:[%s469_s20 + $0xa0] sm:$0xff] }
  0x17   : > { %316 = vst [vmem:[%s497_s25] sm:$0xff] %v284_v27  ;;  %317 = vst [vmem:[%s497_s25 + $0x8] sm:$0xff] %v285_v28  ;;  %v290_v39 = vmax.f32 %v258_v30, 0.0  ;;  %v221_v40 = vmul.f32 %v464_v0, %v182_v24  ;;  %v222_v41 = vmul.f32 %v464_v0, %v183_v25  ;;  %v223_v42 = vmul.f32 %v464_v0, %v184_v26  ;;  %v195_v3 = vld [vmem:[%s469_s20 + $0xa8] sm:$0xff]  ;;  %v196_v8 = vld [vmem:[%s469_s20 + $0xb0] sm:$0xff] }
  0x18   : > { %318 = vst [vmem:[%s497_s25 + $0x10] sm:$0xff] %v286_v29  ;;  %319 = vst [vmem:[%s497_s25 + $0x18] sm:$0xff] %v287_v34  ;;  %v291_v44 = vmax.f32 %v259_v37, 0.0  ;;  %v224_v45 = vmul.f32 %v464_v0, %v185_v31  ;;  %v225_v46 = vmul.f32 %v464_v0, %v186_v32  ;;  %v226_v47 = vmul.f32 %v464_v0, %v187_v33  ;;  %v197_v13 = vld [vmem:[%s469_s20 + $0xb8] sm:$0xff]  ;;  %v198_v26 = vld [vmem:[%s469_s20 + $0xc0] sm:$0xff] }
  0x19   : > { %320 = vst [vmem:[%s497_s25 + $0x20] sm:$0xff] %v288_v35  ;;  %321 = vst [vmem:[%s497_s25 + $0x28] sm:$0xff] %v289_v36  ;;  %v260_v48 = vadd.f32 %v474_v1, %v221_v40  ;;  %v261_v49 = vadd.f32 %v474_v1, %v222_v41  ;;  %v262_v50 = vadd.f32 %v474_v1, %v223_v42  ;;  %v199_v27 = vld [vmem:[%s469_s20 + $0xc8] sm:$0xff]  ;;  %v200_v28 = vld [vmem:[%s469_s20 + $0xd0] sm:$0xff] }
  0x1a   : > { %322 = vst [vmem:[%s497_s25 + $0x30] sm:$0xff] %v290_v39  ;;  %v227_v51 = vmul.f32 %v464_v0, %v188_v38  ;;  %323 = vst [vmem:[%s497_s25 + $0x38] sm:$0xff] %v291_v44  ;;  %v263_v52 = vadd.f32 %v474_v1, %v224_v45  ;;  %v264_v53 = vadd.f32 %v474_v1, %v225_v46  ;;  %v201_v33 = vld [vmem:[%s469_s20 + $0xd8] sm:$0xff]  ;;  %v202_v34 = vld [vmem:[%s469_s20 + $0xe0] sm:$0xff] }
  0x1b   : > { %v265_v54 = vadd.f32 %v474_v1, %v226_v47  ;;  %v228_v55 = vmul.f32 %v464_v0, %v189_v43  ;;  %v292_v59 = vmax.f32 %v260_v48, 0.0  ;;  %v293_v60 = vmax.f32 %v261_v49, 0.0  ;;  %v203_v35 = vld [vmem:[%s469_s20 + $0xe8] sm:$0xff]  ;;  %v204_v40 = vld [vmem:[%s469_s20 + $0xf0] sm:$0xff]  ;;  %v205_v45 = vld [vmem:[%s469_s20 + $0xf8] sm:$0xff] }
  0x1c   : > { %v294_v61 = vmax.f32 %v262_v50, 0.0  ;;  %v266_v62 = vadd.f32 %v474_v1, %v227_v51  ;;  %v295_v4 = vmax.f32 %v263_v52, 0.0  ;;  %v296_v5 = vmax.f32 %v264_v53, 0.0 }
  0x1d   : > { %v297_v6 = vmax.f32 %v265_v54, 0.0  ;;  %v267_v7 = vadd.f32 %v474_v1, %v228_v55  ;;  %324 = vst [vmem:[%s497_s25 + $0x40] sm:$0xff] %v292_v59  ;;  %325 = vst [vmem:[%s497_s25 + $0x48] sm:$0xff] %v293_v60  ;;  %v229_v10 = vmul.f32 %v464_v0, %v190_v56  ;;  %v230_v11 = vmul.f32 %v464_v0, %v191_v57 }
  0x1e   : > { %326 = vst [vmem:[%s497_s25 + $0x50] sm:$0xff] %v294_v61  ;;  %v298_v9 = vmax.f32 %v266_v62, 0.0  ;;  %v231_v12 = vmul.f32 %v464_v0, %v192_v58  ;;  %327 = vst [vmem:[%s497_s25 + $0x58] sm:$0xff] %v295_v4  ;;  %v232_v15 = vmul.f32 %v464_v0, %v193_v63  ;;  %v233_v16 = vmul.f32 %v464_v0, %v194_v2 }
  0x1f   : > { %328 = vst [vmem:[%s497_s25 + $0x60] sm:$0xff] %v296_v5  ;;  %329 = vst [vmem:[%s497_s25 + $0x68] sm:$0xff] %v297_v6  ;;  %v299_v14 = vmax.f32 %v267_v7, 0.0  ;;  %v234_v17 = vmul.f32 %v464_v0, %v195_v3  ;;  %v268_v18 = vadd.f32 %v474_v1, %v229_v10  ;;  %v269_v19 = vadd.f32 %v474_v1, %v230_v11 }
  0x20   : > { %330 = vst [vmem:[%s497_s25 + $0x70] sm:$0xff] %v298_v9  ;;  %v270_v20 = vadd.f32 %v474_v1, %v231_v12  ;;  %v235_v21 = vmul.f32 %v464_v0, %v196_v8  ;;  %v271_v22 = vadd.f32 %v474_v1, %v232_v15  ;;  %v272_v23 = vadd.f32 %v474_v1, %v233_v16 }
  0x21   : > { %331 = vst [vmem:[%s497_s25 + $0x78] sm:$0xff] %v299_v14  ;;  %v273_v24 = vadd.f32 %v474_v1, %v234_v17  ;;  %v236_v25 = vmul.f32 %v464_v0, %v197_v13  ;;  %v300_v29 = vmax.f32 %v268_v18, 0.0  ;;  %v301_v30 = vmax.f32 %v269_v19, 0.0 }
  0x22   : > { %v302_v31 = vmax.f32 %v270_v20, 0.0  ;;  %v274_v32 = vadd.f32 %v474_v1, %v235_v21  ;;  %v303_v36 = vmax.f32 %v271_v22, 0.0  ;;  %v304_v37 = vmax.f32 %v272_v23, 0.0 }
  0x23   : > { %v305_v38 = vmax.f32 %v273_v24, 0.0  ;;  %v275_v39 = vadd.f32 %v474_v1, %v236_v25  ;;  %332 = vst [vmem:[%s497_s25 + $0x80] sm:$0xff] %v300_v29  ;;  %333 = vst [vmem:[%s497_s25 + $0x88] sm:$0xff] %v301_v30  ;;  %v237_v42 = vmul.f32 %v464_v0, %v198_v26  ;;  %v238_v43 = vmul.f32 %v464_v0, %v199_v27 }
  0x24   : > { %334 = vst [vmem:[%s497_s25 + $0x90] sm:$0xff] %v302_v31  ;;  %v306_v41 = vmax.f32 %v274_v32, 0.0  ;;  %v239_v44 = vmul.f32 %v464_v0, %v200_v28  ;;  %335 = vst [vmem:[%s497_s25 + $0x98] sm:$0xff] %v303_v36  ;;  %v240_v47 = vmul.f32 %v464_v0, %v201_v33  ;;  %v241_v48 = vmul.f32 %v464_v0, %v202_v34 }
  0x25   : > { %336 = vst [vmem:[%s497_s25 + $0xa0] sm:$0xff] %v304_v37  ;;  %337 = vst [vmem:[%s497_s25 + $0xa8] sm:$0xff] %v305_v38  ;;  %v307_v46 = vmax.f32 %v275_v39, 0.0  ;;  %v242_v49 = vmul.f32 %v464_v0, %v203_v35  ;;  %v276_v50 = vadd.f32 %v474_v1, %v237_v42  ;;  %v277_v51 = vadd.f32 %v474_v1, %v238_v43 }
  0x26   : > { %338 = vst [vmem:[%s497_s25 + $0xb0] sm:$0xff] %v306_v41  ;;  %v278_v52 = vadd.f32 %v474_v1, %v239_v44  ;;  %v243_v53 = vmul.f32 %v464_v0, %v204_v40  ;;  %v279_v54 = vadd.f32 %v474_v1, %v240_v47  ;;  %v280_v55 = vadd.f32 %v474_v1, %v241_v48 }
  0x27   : > { %339 = vst [vmem:[%s497_s25 + $0xb8] sm:$0xff] %v307_v46  ;;  %v281_v56 = vadd.f32 %v474_v1, %v242_v49  ;;  %v244_v57 = vmul.f32 %v464_v0, %v205_v45  ;;  %v308_v58 = vmax.f32 %v276_v50, 0.0  ;;  %v309_v59 = vmax.f32 %v277_v51, 0.0 }
  0x28   : > { %v310_v60 = vmax.f32 %v278_v52, 0.0  ;;  %v282_v61 = vadd.f32 %v474_v1, %v243_v53  ;;  %v311_v62 = vmax.f32 %v279_v54, 0.0  ;;  %v312_v63 = vmax.f32 %v280_v55, 0.0 }
  0x29   : > { %v313_v2 = vmax.f32 %v281_v56, 0.0  ;;  %v283_v3 = vadd.f32 %v474_v1, %v244_v57  ;;  %340 = vst [vmem:[%s497_s25 + $0xc0] sm:$0xff] %v308_v58  ;;  %341 = vst [vmem:[%s497_s25 + $0xc8] sm:$0xff] %v309_v59 }
  0x2a   : > { %342 = vst [vmem:[%s497_s25 + $0xd0] sm:$0xff] %v310_v60  ;;  %v314_v4 = vmax.f32 %v282_v61, 0.0  ;;  %343 = vst [vmem:[%s497_s25 + $0xd8] sm:$0xff] %v311_v62 }
  0x2b   : > { %344 = vst [vmem:[%s497_s25 + $0xe0] sm:$0xff] %v312_v63  ;;  %345 = vst [vmem:[%s497_s25 + $0xe8] sm:$0xff] %v313_v2  ;;  %v315_v0 = vmax.f32 %v283_v3, 0.0 }
  0x2c   : > { %346 = vst [vmem:[%s497_s25 + $0xf0] sm:$0xff] %v314_v4 }
  0x2d   : > { %347 = vst [vmem:[%s497_s25 + $0xf8] sm:$0xff] %v315_v0 }
  0x2e PF: > { %s13_s12 = sadd.s32 1, %s431_s12  }
  0x2f   : > { %p10_p4 = scmp.ge.s32.totalorder %s13_s12, 4  }
  0x31   :  { %12 = sbr.rel (!%p10_p4) target bundleno = 1 (0x1), region = 62 }

// kernel: basic_block_forward.6
= control target key start
LH: loop header
LB: loop body
LE: loop exit
PB: predicated region body
PF: predicated region fallthrough
CT: control target
= control target key end

     0   :  { %s951_s12 = smov 0   ;;  %s1134_s0 = inlined_call_operand.vmem [shape: bf16[512,128], index: 0, kind: input, shape index: {}]   ;;  %s1135_s1 = inlined_call_operand.vmem [shape: bf16[128,128], index: 1, kind: input, shape index: {}]   ;;  %s1136_s2 = inlined_call_operand.vmem [shape: f32[512,128], index: 2, kind: output, shape index: {0}]   ;;  %s1137_s3 = inlined_call_operand.vmem [shape: f32[2,2,128], index: 3, kind: output, shape index: {1}]  }
   0x1 LB: > { %s957_s13 = sadd.s32 4294967295, %s929_s12   ;;  %p771_p0 = scmp.ge.s32.totalorder %s929_s12, 1  ;;  %s929_s12 = sphi %s951_s12, %s14_s12  }
   0x2   : > { %p141_p1 = scmp.lt.s32.totalorder %s929_s12, 3 }
   0x4   : > { %p142_p2 = pnand %p771_p0, %p141_p1 }
   0x5   : > { %v899_v0 = vld [vmem:[%s1135_s1] sm:$0xff] (!%p142_p2)   ;;  %s772_s16 = sshll.u32 (!%p142_p2), %s957_s13, 5  ;;  %v900_v1 = vld [vmem:[%s1135_s1 + $0x8] sm:$0xff] (!%p142_p2)   ;;  %v901_v2 = vld [vmem:[%s1135_s1 + $0x10] sm:$0xff] (!%p142_p2)   ;;  %p181_p4 = scmp.lt.s32.totalorder (!%p142_p2), %s957_s13, 1  ;;  %vm677_vm0 = vcmask (!%p142_p2), 1040384  }
   0x6   : > { %145 = sbr.rel (%p142_p2) target bundleno = 331 (0x14b), region = 28  ;;  %p170_p3 = scmp.lt.s32.totalorder (!%p142_p2), %s772_s16, 63  ;;  %827 = vmatprep.subr.bf16.mxu0 (!%p142_p2), %v899_v0  ;;  %875 = vmatprep.subr.bf16.mxu1 (!%p142_p2), %v899_v0  ;;  %v902_v3 = vld [vmem:[%s1135_s1 + $0x18] sm:$0xff] (!%p142_p2)   ;;  %v903_v5 = vld [vmem:[%s1135_s1 + $0x20] sm:$0xff] (!%p142_p2)   ;;  %v904_v6 = vld [vmem:[%s1135_s1 + $0x28] sm:$0xff] (!%p142_p2)  }
   0x7   : > { %828 = vmatpush3.bf16.msra.mxu0 (!%p142_p2), %v899_v0  ;;  %883 = vmatpush3.bf16.msra.mxu1 (!%p142_p2), %v899_v0  ;;  %v905_v8 = vld [vmem:[%s1135_s1 + $0x30] sm:$0xff] (!%p142_p2)   ;;  %v906_v9 = vld [vmem:[%s1135_s1 + $0x38] sm:$0xff] (!%p142_p2)  }
   0x8   : > { %829 = vmatprep.subr.bf16.mxu0 (!%p142_p2), %v900_v1  ;;  %876 = vmatprep.subr.bf16.mxu1 (!%p142_p2), %v900_v1 }
   0xb   : > { %830 = vmatpush3.bf16.msra.mxu0 (!%p142_p2), %v900_v1  ;;  %884 = vmatpush3.bf16.msra.mxu1 (!%p142_p2), %v900_v1 }
   0xc   : > { %831 = vmatprep.subr.bf16.mxu0 (!%p142_p2), %v901_v2  ;;  %877 = vmatprep.subr.bf16.mxu1 (!%p142_p2), %v901_v2 }
   0xd   : > { %s1139_s16 = smov (!%p170_p3, %s772_s16), 63  ;;  %s1141_s13 = smov (!%p181_p4, %s957_s13), 1 }
   0xe   : > { %s773_s21 = sshll.u32 %s1139_s16, 2  ;;  %s775_s8 = sshll.u32 %s1139_s16, 3 }
   0xf   : > { %s977_s24 = scalar_lea.vmem %s1134_s0, %s773_s21  ;;  %832 = vmatpush3.bf16.msra.mxu0 %v901_v2  ;;  %885 = vmatpush3.bf16.msra.mxu1 %v901_v2  ;;  %s1014_s11 = scalar_lea.vmem %s1136_s2, %s775_s8 }
  0x10   : > { %v907_v4 = vld [vmem:[%s977_s24] sm:$0xff]   ;;  %833 = vmatprep.subr.bf16.mxu0 %v902_v3  ;;  %878 = vmatprep.subr.bf16.mxu1 %v902_v3  ;;  %v908_v10 = vld [vmem:[%s977_s24 + $0x8] sm:$0xff]   ;;  %v909_v12 = vld [vmem:[%s977_s24 + $0x10] sm:$0xff]   ;;  %s776_s14 = sshll.u32 %s1141_s13, 1 }
  0x11   : > { %843 = vmatprep.mubr.bf16.mxu0 %v907_v4  ;;  %v915_v7 = vld [vmem:[%s977_s24 + $0x40] sm:$0xff]   ;;  %v916_v11 = vld [vmem:[%s977_s24 + $0x48] sm:$0xff]   ;;  %v917_v13 = vld [vmem:[%s977_s24 + $0x50] sm:$0xff]   ;;  %s184_s17 = scalar_lea.vmem %s1137_s3, %s776_s14 }
  0x12   : > { %859 = vmatprep.mubr.bf16.mxu1 %v915_v7  ;;  %v910_v14 = vld [vmem:[%s977_s24 + $0x18] sm:$0xff]   ;;  %v911_v16 = vld [vmem:[%s977_s24 + $0x20] sm:$0xff]   ;;  %v912_v18 = vld [vmem:[%s977_s24 + $0x28] sm:$0xff]  }
  0x13   : > { %834 = vmatpush3.bf16.msra.mxu0 %v902_v3  ;;  %886 = vmatpush3.bf16.msra.mxu1 %v902_v3  ;;  %v918_v15 = vld [vmem:[%s977_s24 + $0x58] sm:$0xff]   ;;  %v919_v17 = vld [vmem:[%s977_s24 + $0x60] sm:$0xff]   ;;  %v920_v19 = vld [vmem:[%s977_s24 + $0x68] sm:$0xff]  }
  0x14   : > { %835 = vmatprep.subr.bf16.mxu0 %v903_v5  ;;  %879 = vmatprep.subr.bf16.mxu1 %v903_v5  ;;  %v913_v20 = vld [vmem:[%s977_s24 + $0x30] sm:$0xff]   ;;  %v914_v22 = vld [vmem:[%s977_s24 + $0x38] sm:$0xff]  }
  0x15   : > { %v921_v21 = vld [vmem:[%s977_s24 + $0x70] sm:$0xff]   ;;  %v922_v23 = vld [vmem:[%s977_s24 + $0x78] sm:$0xff]  }
  0x17   : > { %836 = vmatpush3.bf16.msra.mxu0 %v903_v5  ;;  %887 = vmatpush3.bf16.msra.mxu1 %v903_v5 }
  0x18   : > { %837 = vmatprep.subr.bf16.mxu0 %v904_v6  ;;  %880 = vmatprep.subr.bf16.mxu1 %v904_v6 }
  0x1b   : > { %838 = vmatpush3.bf16.msra.mxu0 %v904_v6  ;;  %888 = vmatpush3.bf16.msra.mxu1 %v904_v6 }
  0x1c   : > { %839 = vmatprep.subr.bf16.mxu0 %v905_v8  ;;  %881 = vmatprep.subr.bf16.mxu1 %v905_v8 }
  0x1f   : > { %840 = vmatpush3.bf16.msra.mxu0 %v905_v8  ;;  %889 = vmatpush3.bf16.msra.mxu1 %v905_v8 }
  0x20   : > { %841 = vmatprep.subr.bf16.mxu0 %v906_v9  ;;  %882 = vmatprep.subr.bf16.mxu1 %v906_v9 }
  0x23   : > { %842 = vmatpush3.bf16.msra.mxu0 %v906_v9  ;;  %890 = vmatpush3.bf16.msra.mxu1 %v906_v9 }
  0x26   : > { %844 = vmatmul.mubr.bf16.vlgmr.msra.gmra.mrb[0].mxu0 %v908_v10  ;;  %860 = vmatmul.mubr.bf16.vlgmr.msra.gmra.mrb[0].mxu1 %v916_v11 }
  0x27   : > { %847 = vmatprep.mubr.bf16.mxu0 %v909_v12  ;;  %863 = vmatprep.mubr.bf16.mxu1 %v917_v13 }
  0x2e   : > { %848 = vmatmul.mubr.bf16.gmra.mrb[4].mxu0 %v910_v14  ;;  %864 = vmatmul.mubr.bf16.gmra.mrb[4].mxu1 %v918_v15 }
  0x2f   : > { %851 = vmatprep.mubr.bf16.mxu0 %v911_v16  ;;  %867 = vmatprep.mubr.bf16.mxu1 %v919_v17 }
  0x36   : > { %852 = vmatmul.mubr.bf16.gmra.mrb[8].mxu0 %v912_v18  ;;  %868 = vmatmul.mubr.bf16.gmra.mrb[8].mxu1 %v920_v19 }
  0x37   : > { %855 = vmatprep.mubr.bf16.mxu0 %v913_v20  ;;  %871 = vmatprep.mubr.bf16.mxu1 %v921_v21 }
  0x3e   : > { %856 = vmatmul.mubr.bf16.gmra.mrb[12].mxu0 %v914_v22  ;;  %872 = vmatmul.mubr.bf16.gmra.mrb[12].mxu1 %v922_v23 }
  0xf9   : > { %v845_v24 = vpop.f32.mrb[0].mxu0  ;;  %v1016_v25 = vpop.f32.mrb[0].mxu1 }
  0xfa   : > { %541 = vst [vmem:[%s1014_s11 + $0x10] sm:$0xff] %v845_v24  ;;  %v412_v26 = vpop.f32.mrb[1].mxu0  ;;  %557 = vst [vmem:[%s1014_s11 + $0x90] sm:$0xff] %v1016_v25  ;;  %v1021_v27 = vpop.f32.mrb[1].mxu1  ;;  %v610_v35 = vmul.f32 %v845_v24, %v845_v24 }
  0xfb   : > { %539 = vst [vmem:[%s1014_s11] sm:$0xff] %v412_v26  ;;  %v846_v28 = vpop.f32.mrb[2].mxu0  ;;  %555 = vst [vmem:[%s1014_s11 + $0x80] sm:$0xff] %v1021_v27  ;;  %v1026_v29 = vpop.f32.mrb[2].mxu1  ;;  %v608_v32 = vmul.f32 %v412_v26, %v412_v26 }
  0xfc   : > { %542 = vst [vmem:[%s1014_s11 + $0x18] sm:$0xff] %v846_v28  ;;  %v415_v30 = vpop.f32.mrb[3].mxu0  ;;  %558 = vst [vmem:[%s1014_s11 + $0x98] sm:$0xff] %v1026_v29  ;;  %v1031_v31 = vpop.f32.mrb[3].mxu1  ;;  %v611_v38 = vmul.f32 %v846_v28, %v846_v28 }
  0xfd   : > { %540 = vst [vmem:[%s1014_s11 + $0x8] sm:$0xff] %v415_v30  ;;  %v571_v33 = vadd.f32 %v415_v30, %v412_v26  ;;  %v609_v34 = vmul.f32 %v415_v30, %v415_v30  ;;  %556 = vst [vmem:[%s1014_s11 + $0x88] sm:$0xff] %v1031_v31 }
  0xff   : > { %v572_v36 = vadd.f32 %v845_v24, %v571_v33  ;;  %v640_v37 = vadd.f32 %v609_v34, %v608_v32 }
 0x101   : > { %v641_v39 = vadd.f32 %v640_v37, %v610_v35  ;;  %v849_v40 = vpop.f32.mrb[4].mxu0  ;;  %v573_v41 = vadd.f32 %v846_v28, %v572_v36  ;;  %v1036_v42 = vpop.f32.mrb[4].mxu1 }
 0x102   : > { %545 = vst [vmem:[%s1014_s11 + $0x30] sm:$0xff] %v849_v40  ;;  %v428_v43 = vpop.f32.mrb[5].mxu0  ;;  %561 = vst [vmem:[%s1014_s11 + $0xb0] sm:$0xff] %v1036_v42  ;;  %v1041_v44 = vpop.f32.mrb[5].mxu1  ;;  %v614_v55 = vmul.f32 %v849_v40, %v849_v40 }
 0x103   : > { %543 = vst [vmem:[%s1014_s11 + $0x20] sm:$0xff] %v428_v43  ;;  %v574_v45 = vadd.f32 %v573_v41, %v428_v43  ;;  %v612_v46 = vmul.f32 %v428_v43, %v428_v43  ;;  %v642_v47 = vadd.f32 %v641_v39, %v611_v38  ;;  %v850_v48 = vpop.f32.mrb[6].mxu0  ;;  %559 = vst [vmem:[%s1014_s11 + $0xa0] sm:$0xff] %v1041_v44  ;;  %v1046_v49 = vpop.f32.mrb[6].mxu1 }
 0x104   : > { %546 = vst [vmem:[%s1014_s11 + $0x38] sm:$0xff] %v850_v48  ;;  %v431_v50 = vpop.f32.mrb[7].mxu0  ;;  %562 = vst [vmem:[%s1014_s11 + $0xb8] sm:$0xff] %v1046_v49  ;;  %v1051_v51 = vpop.f32.mrb[7].mxu1  ;;  %v615_v58 = vmul.f32 %v850_v48, %v850_v48  ;;  %v624_v41 = vmul.f32 %v1021_v27, %v1021_v27 }
 0x105   : > { %v643_v52 = vadd.f32 %v642_v47, %v612_v46  ;;  %544 = vst [vmem:[%s1014_s11 + $0x28] sm:$0xff] %v431_v50  ;;  %v575_v53 = vadd.f32 %v574_v45, %v431_v50  ;;  %v613_v54 = vmul.f32 %v431_v50, %v431_v50  ;;  %560 = vst [vmem:[%s1014_s11 + $0xa8] sm:$0xff] %v1051_v51 }
 0x106   : > { %v626_v50 = vmul.f32 %v1016_v25, %v1016_v25 }
 0x107   : > { %v576_v56 = vadd.f32 %v849_v40, %v575_v53  ;;  %v644_v57 = vadd.f32 %v643_v52, %v613_v54  ;;  %v627_v54 = vmul.f32 %v1026_v29, %v1026_v29 }
 0x109   : > { %v645_v59 = vadd.f32 %v644_v57, %v614_v55  ;;  %v853_v60 = vpop.f32.mrb[8].mxu0  ;;  %v577_v61 = vadd.f32 %v850_v48, %v576_v56  ;;  %v1056_v62 = vpop.f32.mrb[8].mxu1  ;;  %v625_v48 = vmul.f32 %v1031_v31, %v1031_v31 }
 0x10a   : > { %549 = vst [vmem:[%s1014_s11 + $0x50] sm:$0xff] %v853_v60  ;;  %v444_v63 = vpop.f32.mrb[9].mxu0  ;;  %565 = vst [vmem:[%s1014_s11 + $0xd0] sm:$0xff] %v1056_v62  ;;  %v1061_v0 = vpop.f32.mrb[9].mxu1  ;;  %v618_v11 = vmul.f32 %v853_v60, %v853_v60 }
 0x10b   : > { %547 = vst [vmem:[%s1014_s11 + $0x40] sm:$0xff] %v444_v63  ;;  %v578_v1 = vadd.f32 %v577_v61, %v444_v63  ;;  %v616_v2 = vmul.f32 %v444_v63, %v444_v63  ;;  %v646_v3 = vadd.f32 %v645_v59, %v615_v58  ;;  %v854_v4 = vpop.f32.mrb[10].mxu0  ;;  %563 = vst [vmem:[%s1014_s11 + $0xc0] sm:$0xff] %v1061_v0  ;;  %v1066_v5 = vpop.f32.mrb[10].mxu1 }
 0x10c   : > { %550 = vst [vmem:[%s1014_s11 + $0x58] sm:$0xff] %v854_v4  ;;  %v447_v6 = vpop.f32.mrb[11].mxu0  ;;  %566 = vst [vmem:[%s1014_s11 + $0xd8] sm:$0xff] %v1066_v5  ;;  %v1071_v7 = vpop.f32.mrb[11].mxu1  ;;  %v619_v14 = vmul.f32 %v854_v4, %v854_v4 }
 0x10d   : > { %v647_v8 = vadd.f32 %v646_v3, %v616_v2  ;;  %548 = vst [vmem:[%s1014_s11 + $0x48] sm:$0xff] %v447_v6  ;;  %v579_v9 = vadd.f32 %v578_v1, %v447_v6  ;;  %v617_v10 = vmul.f32 %v447_v6, %v447_v6  ;;  %564 = vst [vmem:[%s1014_s11 + $0xc8] sm:$0xff] %v1071_v7 }
 0x10f   : > { %v580_v12 = vadd.f32 %v853_v60, %v579_v9  ;;  %v648_v13 = vadd.f32 %v647_v8, %v617_v10  ;;  %v629_v60 = vmul.f32 %v1051_v51, %v1051_v51  ;;  %v633_v8 = vmul.f32 %v1071_v7, %v1071_v7 }
 0x111   : > { %v649_v15 = vadd.f32 %v648_v13, %v618_v11  ;;  %v857_v16 = vpop.f32.mrb[12].mxu0  ;;  %v581_v17 = vadd.f32 %v854_v4, %v580_v12  ;;  %v1076_v18 = vpop.f32.mrb[12].mxu1 }
 0x112   : > { %553 = vst [vmem:[%s1014_s11 + $0x70] sm:$0xff] %v857_v16  ;;  %v460_v19 = vpop.f32.mrb[13].mxu0  ;;  %569 = vst [vmem:[%s1014_s11 + $0xf0] sm:$0xff] %v1076_v18  ;;  %v524_v20 = vpop.f32.mrb[13].mxu1  ;;  %v622_v35 = vmul.f32 %v857_v16, %v857_v16 }
 0x113   : > { %551 = vst [vmem:[%s1014_s11 + $0x60] sm:$0xff] %v460_v19  ;;  %v582_v21 = vadd.f32 %v581_v17, %v460_v19  ;;  %v620_v22 = vmul.f32 %v460_v19, %v460_v19  ;;  %v650_v23 = vadd.f32 %v649_v15, %v619_v14  ;;  %v858_v24 = vpop.f32.mrb[14].mxu0  ;;  %567 = vst [vmem:[%s1014_s11 + $0xe0] sm:$0xff] %v524_v20  ;;  %v874_v26 = vpop.f32.mrb[14].mxu1 }
 0x114   : > { %554 = vst [vmem:[%s1014_s11 + $0x78] sm:$0xff] %v858_v24  ;;  %v463_v28 = vpop.f32.mrb[15].mxu0  ;;  %570 = vst [vmem:[%s1014_s11 + $0xf8] sm:$0xff] %v874_v26  ;;  %v527_v30 = vpop.f32.mrb[15].mxu1  ;;  %v623_v38 = vmul.f32 %v858_v24, %v858_v24  ;;  %v636_v12 = vmul.f32 %v524_v20, %v524_v20  ;;  %v638_v17 = vmul.f32 %v1076_v18, %v1076_v18 }
 0x115   : > { %v651_v32 = vadd.f32 %v650_v23, %v620_v22  ;;  %552 = vst [vmem:[%s1014_s11 + $0x68] sm:$0xff] %v463_v28  ;;  %v583_v33 = vadd.f32 %v582_v21, %v463_v28  ;;  %v621_v34 = vmul.f32 %v463_v28, %v463_v28  ;;  %568 = vst [vmem:[%s1014_s11 + $0xe8] sm:$0xff] %v527_v30 }
 0x116   : > { %v639_v21 = vmul.f32 %v874_v26, %v874_v26 }
 0x117   : > { %v584_v36 = vadd.f32 %v857_v16, %v583_v33  ;;  %v652_v37 = vadd.f32 %v651_v32, %v621_v34 }
 0x119   : > { %v653_v39 = vadd.f32 %v652_v37, %v622_v35  ;;  %v585_v40 = vadd.f32 %v858_v24, %v584_v36 }
 0x11b   : > { %v586_v43 = vadd.f32 %v585_v40, %v1021_v27  ;;  %v654_v45 = vadd.f32 %v653_v39, %v623_v38  ;;  %v628_v27 = vmul.f32 %v1041_v44, %v1041_v44 }
 0x11d   : > { %v655_v46 = vadd.f32 %v654_v45, %v624_v41  ;;  %v587_v47 = vadd.f32 %v586_v43, %v1031_v31 }
 0x11f   : > { %v588_v52 = vadd.f32 %v1016_v25, %v587_v47  ;;  %v656_v53 = vadd.f32 %v655_v46, %v625_v48  ;;  %v630_v25 = vmul.f32 %v1036_v42, %v1036_v42 }
 0x121   : > { %v657_v55 = vadd.f32 %v656_v53, %v626_v50  ;;  %v589_v56 = vadd.f32 %v1026_v29, %v588_v52  ;;  %v631_v29 = vmul.f32 %v1046_v49, %v1046_v49 }
 0x123   : > { %v590_v57 = vadd.f32 %v589_v56, %v1041_v44  ;;  %v658_v58 = vadd.f32 %v657_v55, %v627_v54  ;;  %v632_v44 = vmul.f32 %v1061_v0, %v1061_v0 }
 0x125   : > { %v659_v59 = vadd.f32 %v658_v58, %v628_v27  ;;  %v591_v31 = vadd.f32 %v590_v57, %v1051_v51 }
 0x127   : > { %v592_v61 = vadd.f32 %v1036_v42, %v591_v31  ;;  %v660_v63 = vadd.f32 %v659_v59, %v629_v60  ;;  %v634_v42 = vmul.f32 %v1056_v62, %v1056_v62 }
 0x129   : > { %v661_v1 = vadd.f32 %v660_v63, %v630_v25  ;;  %v593_v2 = vadd.f32 %v1046_v49, %v592_v61  ;;  %v635_v49 = vmul.f32 %v1066_v5, %v1066_v5 }
 0x12b   : > { %v594_v3 = vadd.f32 %v593_v2, %v1061_v0  ;;  %v662_v4 = vadd.f32 %v661_v1, %v631_v29 }
 0x12d   : > { %v663_v6 = vadd.f32 %v662_v4, %v632_v44  ;;  %v595_v51 = vadd.f32 %v594_v3, %v1071_v7  ;;  %v637_v7 = vmul.f32 %v527_v30, %v527_v30 }
 0x12f   : > { %v596_v9 = vadd.f32 %v1056_v62, %v595_v51  ;;  %v664_v10 = vadd.f32 %v663_v6, %v633_v8 }
 0x131   : > { %v665_v11 = vadd.f32 %v664_v10, %v634_v42  ;;  %v597_v0 = vadd.f32 %v1066_v5, %v596_v9 }
 0x133   : > { %v598_v13 = vadd.f32 %v597_v0, %v524_v20  ;;  %v666_v14 = vadd.f32 %v665_v11, %v635_v49 }
 0x135   : > { %v667_v15 = vadd.f32 %v666_v14, %v636_v12  ;;  %v599_v16 = vadd.f32 %v598_v13, %v527_v30 }
 0x137   : > { %v600_v62 = vadd.f32 %v1076_v18, %v599_v16  ;;  %v668_v19 = vadd.f32 %v667_v15, %v637_v7 }
 0x139   : > { %v601_v22 = vadd.f32 %v874_v26, %v600_v62  ;;  %v669_v23 = vadd.f32 %v668_v19, %v638_v17 }
 0x13b   : > { %v602_v24 = vrot.slane %v601_v22, 4  ;;  %v670_v28 = vadd.f32 %v669_v23, %v639_v21 }
 0x13d   : > { %v603_v5 = vadd.f32 %v602_v24, %v601_v22  ;;  %v671_v32 = vrot.slane %v670_v28, 4 }
 0x13f   : > { %v604_v20 = vrot.slane %v603_v5, 2  ;;  %v672_v33 = vadd.f32 %v671_v32, %v670_v28 }
 0x141   : > { %v605_v34 = vadd.f32 %v604_v20, %v603_v5  ;;  %v673_v35 = vrot.slane %v672_v33, 2 }
 0x143   : > { %v606_v30 = vrot.slane %v605_v34, 1  ;;  %v674_v36 = vadd.f32 %v673_v35, %v672_v33 }
 0x145   : > { %v675_v37 = vrot.slane %v674_v36, 1  ;;  %v607_v18 = vadd.f32 %v606_v30, %v605_v34 }
 0x147   : > { %v676_v26 = vadd.f32 %v675_v37, %v674_v36 }
 0x149   : > { %v678_v38 = vsel %vm677_vm0, %v607_v18, %v676_v26 }
 0x14a   : > { %679 = vst [vmem:[%s184_s17] sm:$0x3] %v678_v38 }
 0x14b PF: > { %s14_s12 = sadd.s32 1, %s929_s12  }
 0x14c   : > { %p11_p5 = scmp.ge.s32.totalorder %s14_s12, 4  }
 0x14e   :  { %13 = sbr.rel (!%p11_p5) target bundleno = 1 (0x1), region = 70 }

// kernel: basic_block_forward.9
= control target key start
LH: loop header
LB: loop body
LE: loop exit
PB: predicated region body
PF: predicated region fallthrough
CT: control target
= control target key end

     0   :  { %s421_s12 = smov 0   ;;  %s580_s0 = inlined_call_operand.vmem [shape: f32[512,128], index: 0, kind: input, shape index: {}]   ;;  %s581_s1 = inlined_call_operand.vmem [shape: f32[1,128], index: 1, kind: input, shape index: {}]   ;;  %s582_s2 = inlined_call_operand.vmem [shape: f32[1,128], index: 2, kind: input, shape index: {}]   ;;  %s583_s3 = inlined_call_operand.vmem [shape: f32[512,128], index: 3, kind: output, shape index: {}]  }
   0x1 LB: > { %s372_s13 = sadd.s32 4294967295, %s399_s12   ;;  %p376_p0 = scmp.ge.s32.totalorder %s399_s12, 1  ;;  %s399_s12 = sphi %s421_s12, %s13_s12  }
   0x2   : > { %p138_p1 = scmp.lt.s32.totalorder %s399_s12, 3 }
   0x4   : > { %p139_p2 = pnand %p376_p0, %p138_p1 }
   0x5   : > { %s377_s14 = sshll.u32 (!%p139_p2), %s372_s13, 5  ;;  %v432_v0 = vld [vmem:[%s581_s1] ss:$0 sm:$0xff] (!%p139_p2) }
   0x6   : > { %142 = sbr.rel (%p139_p2) target bundleno = 40 (0x28), region = 32  ;;  %p163_p3 = scmp.lt.s32.totalorder (!%p139_p2), %s377_s14, 63  ;;  %v442_v1 = vld [vmem:[%s582_s2] ss:$0 sm:$0xff] (!%p139_p2) }
   0xd   : > { %s585_s14 = smov (!%p163_p3, %s377_s14), 63 }
   0xe   : > { %s378_s15 = sshll.u32 %s585_s14, 3 }
   0xf   : > { %s437_s20 = scalar_lea.vmem %s580_s0, %s378_s15  ;;  %s456_s25 = scalar_lea.vmem %s583_s3, %s378_s15 }
  0x10   : > { %v174_v2 = vld [vmem:[%s437_s20] sm:$0xff]  ;;  %v175_v3 = vld [vmem:[%s437_s20 + $0x8] sm:$0xff]  ;;  %v176_v4 = vld [vmem:[%s437_s20 + $0x10] sm:$0xff] }
  0x11   : > { %v213_v5 = vmul.f32 %v432_v0, %v174_v2  ;;  %v214_v6 = vmul.f32 %v432_v0, %v175_v3  ;;  %v215_v7 = vmul.f32 %v432_v0, %v176_v4  ;;  %v177_v8 = vld [vmem:[%s437_s20 + $0x18] sm:$0xff]  ;;  %v178_v9 = vld [vmem:[%s437_s20 + $0x20] sm:$0xff]  ;;  %v179_v10 = vld [vmem:[%s437_s20 + $0x28] sm:$0xff] }
  0x12   : > { %v216_v11 = vmul.f32 %v432_v0, %v177_v8  ;;  %v217_v12 = vmul.f32 %v432_v0, %v178_v9  ;;  %v218_v13 = vmul.f32 %v432_v0, %v179_v10  ;;  %v180_v14 = vld [vmem:[%s437_s20 + $0x30] sm:$0xff]  ;;  %v181_v15 = vld [vmem:[%s437_s20 + $0x38] sm:$0xff]  ;;  %v182_v16 = vld [vmem:[%s437_s20 + $0x40] sm:$0xff] }
  0x13   : > { %v252_v17 = vadd.f32 %v442_v1, %v213_v5  ;;  %v253_v18 = vadd.f32 %v442_v1, %v214_v6  ;;  %v254_v19 = vadd.f32 %v442_v1, %v215_v7  ;;  %v219_v20 = vmul.f32 %v432_v0, %v180_v14  ;;  %v183_v21 = vld [vmem:[%s437_s20 + $0x48] sm:$0xff]  ;;  %v184_v22 = vld [vmem:[%s437_s20 + $0x50] sm:$0xff]  ;;  %v185_v23 = vld [vmem:[%s437_s20 + $0x58] sm:$0xff] }
  0x14   : > { %v255_v24 = vadd.f32 %v442_v1, %v216_v11  ;;  %v256_v25 = vadd.f32 %v442_v1, %v217_v12  ;;  %v257_v26 = vadd.f32 %v442_v1, %v218_v13  ;;  %v220_v27 = vmul.f32 %v432_v0, %v181_v15  ;;  %v186_v28 = vld [vmem:[%s437_s20 + $0x60] sm:$0xff]  ;;  %v187_v29 = vld [vmem:[%s437_s20 + $0x68] sm:$0xff]  ;;  %v188_v30 = vld [vmem:[%s437_s20 + $0x70] sm:$0xff] }
  0x15   : > { %284 = vst [vmem:[%s456_s25] sm:$0xff] %v252_v17  ;;  %285 = vst [vmem:[%s456_s25 + $0x8] sm:$0xff] %v253_v18  ;;  %v258_v31 = vadd.f32 %v442_v1, %v219_v20  ;;  %v221_v32 = vmul.f32 %v432_v0, %v182_v16  ;;  %v222_v33 = vmul.f32 %v432_v0, %v183_v21  ;;  %v189_v35 = vld [vmem:[%s437_s20 + $0x78] sm:$0xff]  ;;  %v190_v40 = vld [vmem:[%s437_s20 + $0x80] sm:$0xff] }
  0x16   : > { %286 = vst [vmem:[%s456_s25 + $0x10] sm:$0xff] %v254_v19  ;;  %v223_v34 = vmul.f32 %v432_v0, %v184_v22  ;;  %287 = vst [vmem:[%s456_s25 + $0x18] sm:$0xff] %v255_v24  ;;  %v259_v36 = vadd.f32 %v442_v1, %v220_v27  ;;  %v224_v37 = vmul.f32 %v432_v0, %v185_v23  ;;  %v191_v41 = vld [vmem:[%s437_s20 + $0x88] sm:$0xff]  ;;  %v192_v42 = vld [vmem:[%s437_s20 + $0x90] sm:$0xff] }
  0x17   : > { %288 = vst [vmem:[%s456_s25 + $0x20] sm:$0xff] %v256_v25  ;;  %289 = vst [vmem:[%s456_s25 + $0x28] sm:$0xff] %v257_v26  ;;  %v225_v38 = vmul.f32 %v432_v0, %v186_v28  ;;  %v226_v39 = vmul.f32 %v432_v0, %v187_v29  ;;  %v260_v43 = vadd.f32 %v442_v1, %v221_v32  ;;  %v193_v47 = vld [vmem:[%s437_s20 + $0x98] sm:$0xff]  ;;  %v194_v48 = vld [vmem:[%s437_s20 + $0xa0] sm:$0xff] }
  0x18   : > { %290 = vst [vmem:[%s456_s25 + $0x30] sm:$0xff] %v258_v31  ;;  %v261_v44 = vadd.f32 %v442_v1, %v222_v33  ;;  %v262_v45 = vadd.f32 %v442_v1, %v223_v34  ;;  %v227_v46 = vmul.f32 %v432_v0, %v188_v30  ;;  %v195_v49 = vld [vmem:[%s437_s20 + $0xa8] sm:$0xff]  ;;  %291 = vst [vmem:[%s456_s25 + $0x38] sm:$0xff] %v259_v36  ;;  %v196_v54 = vld [vmem:[%s437_s20 + $0xb0] sm:$0xff] }
  0x19   : > { %v263_v50 = vadd.f32 %v442_v1, %v224_v37  ;;  %v264_v51 = vadd.f32 %v442_v1, %v225_v38  ;;  %v265_v52 = vadd.f32 %v442_v1, %v226_v39  ;;  %v228_v53 = vmul.f32 %v432_v0, %v189_v35  ;;  %292 = vst [vmem:[%s456_s25 + $0x40] sm:$0xff] %v260_v43  ;;  %v197_v59 = vld [vmem:[%s437_s20 + $0xb8] sm:$0xff]  ;;  %v198_v2 = vld [vmem:[%s437_s20 + $0xc0] sm:$0xff]  ;;  %v199_v3 = vld [vmem:[%s437_s20 + $0xc8] sm:$0xff] }
  0x1a   : > { %293 = vst [vmem:[%s456_s25 + $0x48] sm:$0xff] %v261_v44  ;;  %294 = vst [vmem:[%s456_s25 + $0x50] sm:$0xff] %v262_v45  ;;  %v266_v55 = vadd.f32 %v442_v1, %v227_v46  ;;  %v229_v56 = vmul.f32 %v432_v0, %v190_v40  ;;  %v230_v57 = vmul.f32 %v432_v0, %v191_v41  ;;  %v200_v4 = vld [vmem:[%s437_s20 + $0xd0] sm:$0xff]  ;;  %v201_v9 = vld [vmem:[%s437_s20 + $0xd8] sm:$0xff] }
  0x1b   : > { %v231_v58 = vmul.f32 %v432_v0, %v192_v42  ;;  %295 = vst [vmem:[%s456_s25 + $0x58] sm:$0xff] %v263_v50  ;;  %296 = vst [vmem:[%s456_s25 + $0x60] sm:$0xff] %v264_v51  ;;  %v267_v60 = vadd.f32 %v442_v1, %v228_v53  ;;  %v232_v61 = vmul.f32 %v432_v0, %v193_v47  ;;  %v202_v10 = vld [vmem:[%s437_s20 + $0xe0] sm:$0xff]  ;;  %v203_v11 = vld [vmem:[%s437_s20 + $0xe8] sm:$0xff] }
  0x1c   : > { %297 = vst [vmem:[%s456_s25 + $0x68] sm:$0xff] %v265_v52  ;;  %v233_v62 = vmul.f32 %v432_v0, %v194_v48  ;;  %v234_v63 = vmul.f32 %v432_v0, %v195_v49  ;;  %298 = vst [vmem:[%s456_s25 + $0x70] sm:$0xff] %v266_v55  ;;  %v268_v5 = vadd.f32 %v442_v1, %v229_v56  ;;  %v204_v16 = vld [vmem:[%s437_s20 + $0xf0] sm:$0xff]  ;;  %v205_v21 = vld [vmem:[%s437_s20 + $0xf8] sm:$0xff] }
  0x1d   : > { %v269_v6 = vadd.f32 %v442_v1, %v230_v57  ;;  %v270_v7 = vadd.f32 %v442_v1, %v231_v58  ;;  %v235_v8 = vmul.f32 %v432_v0, %v196_v54  ;;  %299 = vst [vmem:[%s456_s25 + $0x78] sm:$0xff] %v267_v60  ;;  %v271_v12 = vadd.f32 %v442_v1, %v232_v61 }
  0x1e   : > { %v272_v13 = vadd.f32 %v442_v1, %v233_v62  ;;  %v273_v14 = vadd.f32 %v442_v1, %v234_v63  ;;  %v236_v15 = vmul.f32 %v432_v0, %v197_v59  ;;  %300 = vst [vmem:[%s456_s25 + $0x80] sm:$0xff] %v268_v5  ;;  %v237_v18 = vmul.f32 %v432_v0, %v198_v2 }
  0x1f   : > { %301 = vst [vmem:[%s456_s25 + $0x88] sm:$0xff] %v269_v6  ;;  %302 = vst [vmem:[%s456_s25 + $0x90] sm:$0xff] %v270_v7  ;;  %v274_v17 = vadd.f32 %v442_v1, %v235_v8  ;;  %v238_v19 = vmul.f32 %v432_v0, %v199_v3  ;;  %v239_v20 = vmul.f32 %v432_v0, %v200_v4 }
  0x20   : > { %303 = vst [vmem:[%s456_s25 + $0x98] sm:$0xff] %v271_v12  ;;  %304 = vst [vmem:[%s456_s25 + $0xa0] sm:$0xff] %v272_v13  ;;  %v275_v22 = vadd.f32 %v442_v1, %v236_v15  ;;  %v240_v23 = vmul.f32 %v432_v0, %v201_v9  ;;  %v241_v24 = vmul.f32 %v432_v0, %v202_v10 }
  0x21   : > { %305 = vst [vmem:[%s456_s25 + $0xa8] sm:$0xff] %v273_v14  ;;  %v242_v25 = vmul.f32 %v432_v0, %v203_v11  ;;  %306 = vst [vmem:[%s456_s25 + $0xb0] sm:$0xff] %v274_v17  ;;  %v276_v26 = vadd.f32 %v442_v1, %v237_v18  ;;  %v277_v27 = vadd.f32 %v442_v1, %v238_v19 }
  0x22   : > { %v278_v28 = vadd.f32 %v442_v1, %v239_v20  ;;  %v243_v29 = vmul.f32 %v432_v0, %v204_v16  ;;  %307 = vst [vmem:[%s456_s25 + $0xb8] sm:$0xff] %v275_v22  ;;  %v279_v30 = vadd.f32 %v442_v1, %v240_v23  ;;  %v280_v31 = vadd.f32 %v442_v1, %v241_v24 }
  0x23   : > { %v281_v32 = vadd.f32 %v442_v1, %v242_v25  ;;  %v244_v33 = vmul.f32 %v432_v0, %v205_v21  ;;  %308 = vst [vmem:[%s456_s25 + $0xc0] sm:$0xff] %v276_v26  ;;  %309 = vst [vmem:[%s456_s25 + $0xc8] sm:$0xff] %v277_v27 }
  0x24   : > { %310 = vst [vmem:[%s456_s25 + $0xd0] sm:$0xff] %v278_v28  ;;  %v282_v34 = vadd.f32 %v442_v1, %v243_v29  ;;  %311 = vst [vmem:[%s456_s25 + $0xd8] sm:$0xff] %v279_v30 }
  0x25   : > { %312 = vst [vmem:[%s456_s25 + $0xe0] sm:$0xff] %v280_v31  ;;  %313 = vst [vmem:[%s456_s25 + $0xe8] sm:$0xff] %v281_v32  ;;  %v283_v35 = vadd.f32 %v442_v1, %v244_v33 }
  0x26   : > { %314 = vst [vmem:[%s456_s25 + $0xf0] sm:$0xff] %v282_v34 }
  0x27   : > { %315 = vst [vmem:[%s456_s25 + $0xf8] sm:$0xff] %v283_v35 }
  0x28 PF: > { %s13_s12 = sadd.s32 1, %s399_s12  }
  0x29   : > { %p10_p4 = scmp.ge.s32.totalorder %s13_s12, 4  }
  0x2b   :  { %12 = sbr.rel (!%p10_p4) target bundleno = 1 (0x1), region = 62 }

// kernel: basic_block_forward.11
= control target key start
LH: loop header
LB: loop body
LE: loop exit
PB: predicated region body
PF: predicated region fallthrough
CT: control target
= control target key end

     0   :  { %s585_s15 = smov 0   ;;  %s786_s0 = inlined_call_operand.vmem [shape: f32[512,128], index: 0, kind: input, shape index: {}]   ;;  %s787_s1 = inlined_call_operand.vmem [shape: f32[1,128], index: 1, kind: input, shape index: {}]   ;;  %s788_s2 = inlined_call_operand.vmem [shape: f32[1,128], index: 2, kind: input, shape index: {}]   ;;  %s789_s3 = inlined_call_operand.vmem [shape: f32[512,128], index: 3, kind: input, shape index: {}]   ;;  %s790_s4 = inlined_call_operand.vmem [shape: f32[512,128], index: 4, kind: output, shape index: {}]  }
   0x1 LB: > { %s529_s16 = sadd.s32 4294967295, %s558_s15   ;;  %p533_p0 = scmp.ge.s32.totalorder %s558_s15, 1  ;;  %s558_s15 = sphi %s585_s15, %s14_s15  }
   0x2   : > { %p174_p1 = scmp.lt.s32.totalorder %s558_s15, 3 }
   0x4   : > { %p175_p2 = pnand %p533_p0, %p174_p1 }
   0x5   : > { %s534_s17 = sshll.u32 (!%p175_p2), %s529_s16, 5  ;;  %v598_v0 = vld [vmem:[%s787_s1] ss:$0 sm:$0xff] (!%p175_p2) }
   0x6   : > { %178 = sbr.rel (%p175_p2) target bundleno = 55 (0x37), region = 36  ;;  %p206_p3 = scmp.lt.s32.totalorder (!%p175_p2), %s534_s17, 63  ;;  %v616_v2 = vld [vmem:[%s788_s2] ss:$0 sm:$0xff] (!%p175_p2) }
   0xd   : > { %s792_s17 = smov (!%p206_p3, %s534_s17), 63 }
   0xe   : > { %s593_s18 = sshll.u32 %s792_s17, 3 }
   0xf   : > { %s604_s23 = scalar_lea.vmem %s786_s0, %s593_s18  ;;  %s610_s26 = scalar_lea.vmem %s789_s3, %s593_s18 }
  0x10   : > { %v223_v1 = vld [vmem:[%s604_s23] sm:$0xff]  ;;  %v224_v3 = vld [vmem:[%s604_s23 + $0x8] sm:$0xff]  ;;  %v225_v7 = vld [vmem:[%s604_s23 + $0x10] sm:$0xff]  ;;  %s646_s5 = scalar_lea.vmem %s790_s4, %s593_s18 }
  0x11   : > { %v262_v4 = vmul.f32 %v598_v0, %v223_v1  ;;  %v333_v5 = vld [vmem:[%s610_s26] sm:$0xff]  ;;  %v263_v6 = vmul.f32 %v598_v0, %v224_v3  ;;  %v334_v8 = vld [vmem:[%s610_s26 + $0x8] sm:$0xff]  ;;  %v264_v9 = vmul.f32 %v598_v0, %v225_v7  ;;  %v226_v10 = vld [vmem:[%s604_s23 + $0x18] sm:$0xff] }
  0x12   : > { %v227_v11 = vld [vmem:[%s604_s23 + $0x20] sm:$0xff]  ;;  %v335_v14 = vld [vmem:[%s610_s26 + $0x10] sm:$0xff]  ;;  %v265_v15 = vmul.f32 %v598_v0, %v226_v10  ;;  %v336_v16 = vld [vmem:[%s610_s26 + $0x18] sm:$0xff] }
  0x13   : > { %v301_v12 = vadd.f32 %v616_v2, %v262_v4  ;;  %v302_v13 = vadd.f32 %v616_v2, %v263_v6  ;;  %v266_v17 = vmul.f32 %v598_v0, %v227_v11  ;;  %v228_v18 = vld [vmem:[%s604_s23 + $0x28] sm:$0xff]  ;;  %v303_v19 = vadd.f32 %v616_v2, %v264_v9  ;;  %v337_v20 = vld [vmem:[%s610_s26 + $0x20] sm:$0xff]  ;;  %v229_v22 = vld [vmem:[%s604_s23 + $0x30] sm:$0xff] }
  0x14   : > { %v267_v21 = vmul.f32 %v598_v0, %v228_v18  ;;  %v230_v23 = vld [vmem:[%s604_s23 + $0x38] sm:$0xff]  ;;  %v304_v26 = vadd.f32 %v616_v2, %v265_v15  ;;  %v338_v28 = vld [vmem:[%s610_s26 + $0x28] sm:$0xff]  ;;  %v268_v31 = vmul.f32 %v598_v0, %v229_v22  ;;  %v231_v33 = vld [vmem:[%s604_s23 + $0x40] sm:$0xff] }
  0x15   : > { %v365_v24 = vadd.f32 %v333_v5, %v301_v12  ;;  %v366_v25 = vadd.f32 %v334_v8, %v302_v13  ;;  %v305_v27 = vadd.f32 %v616_v2, %v266_v17  ;;  %v367_v29 = vadd.f32 %v335_v14, %v303_v19  ;;  %v232_v34 = vld [vmem:[%s604_s23 + $0x48] sm:$0xff]  ;;  %v339_v39 = vld [vmem:[%s610_s26 + $0x30] sm:$0xff]  ;;  %v340_v40 = vld [vmem:[%s610_s26 + $0x38] sm:$0xff] }
  0x16   : > { %v306_v30 = vadd.f32 %v616_v2, %v267_v21  ;;  %v269_v32 = vmul.f32 %v598_v0, %v230_v23  ;;  %v368_v37 = vadd.f32 %v336_v16, %v304_v26  ;;  %v233_v41 = vld [vmem:[%s604_s23 + $0x50] sm:$0xff]  ;;  %v307_v44 = vadd.f32 %v616_v2, %v268_v31  ;;  %v234_v46 = vld [vmem:[%s604_s23 + $0x58] sm:$0xff]  ;;  %v235_v47 = vld [vmem:[%s604_s23 + $0x60] sm:$0xff] }
  0x17   : > { %v397_v35 = vmax.f32 %v365_v24, 0.0  ;;  %v398_v36 = vmax.f32 %v366_v25, 0.0  ;;  %v369_v38 = vadd.f32 %v337_v20, %v305_v27  ;;  %v399_v42 = vmax.f32 %v367_v29, 0.0  ;;  %v236_v52 = vld [vmem:[%s604_s23 + $0x68] sm:$0xff]  ;;  %v341_v56 = vld [vmem:[%s610_s26 + $0x40] sm:$0xff]  ;;  %v343_v61 = vld [vmem:[%s610_s26 + $0x50] sm:$0xff] }
  0x18   : > { %v370_v43 = vadd.f32 %v338_v28, %v306_v30  ;;  %v308_v45 = vadd.f32 %v616_v2, %v269_v32  ;;  %v400_v48 = vmax.f32 %v368_v37, 0.0  ;;  %v270_v50 = vmul.f32 %v598_v0, %v231_v33  ;;  %v342_v57 = vld [vmem:[%s610_s26 + $0x48] sm:$0xff]  ;;  %v237_v1 = vld [vmem:[%s604_s23 + $0x70] sm:$0xff]  ;;  %v238_v3 = vld [vmem:[%s604_s23 + $0x78] sm:$0xff] }
  0x19   : > { %429 = vst [vmem:[%s646_s5] sm:$0xff] %v397_v35  ;;  %430 = vst [vmem:[%s646_s5 + $0x8] sm:$0xff] %v398_v36  ;;  %v401_v49 = vmax.f32 %v369_v38, 0.0  ;;  %v271_v51 = vmul.f32 %v598_v0, %v232_v34  ;;  %v371_v54 = vadd.f32 %v339_v39, %v307_v44  ;;  %v272_v58 = vmul.f32 %v598_v0, %v233_v41  ;;  %v344_v7 = vld [vmem:[%s610_s26 + $0x58] sm:$0xff]  ;;  %v345_v8 = vld [vmem:[%s610_s26 + $0x60] sm:$0xff] }
  0x1a   : > { %431 = vst [vmem:[%s646_s5 + $0x10] sm:$0xff] %v399_v42  ;;  %v402_v53 = vmax.f32 %v370_v43, 0.0  ;;  %v372_v55 = vadd.f32 %v340_v40, %v308_v45  ;;  %432 = vst [vmem:[%s646_s5 + $0x18] sm:$0xff] %v400_v48  ;;  %v309_v59 = vadd.f32 %v616_v2, %v270_v50  ;;  %v273_v62 = vmul.f32 %v598_v0, %v234_v46  ;;  %v346_v14 = vld [vmem:[%s610_s26 + $0x68] sm:$0xff]  ;;  %v239_v19 = vld [vmem:[%s604_s23 + $0x80] sm:$0xff] }
  0x1b   : > { %433 = vst [vmem:[%s646_s5 + $0x20] sm:$0xff] %v401_v49  ;;  %v310_v60 = vadd.f32 %v616_v2, %v271_v51  ;;  %v274_v63 = vmul.f32 %v598_v0, %v235_v47  ;;  %v403_v4 = vmax.f32 %v371_v54, 0.0  ;;  %v311_v6 = vadd.f32 %v616_v2, %v272_v58  ;;  %v240_v20 = vld [vmem:[%s604_s23 + $0x88] sm:$0xff]  ;;  %v347_v25 = vld [vmem:[%s610_s26 + $0x70] sm:$0xff]  ;;  %v348_v26 = vld [vmem:[%s610_s26 + $0x78] sm:$0xff] }
  0x1c   : > { %434 = vst [vmem:[%s646_s5 + $0x28] sm:$0xff] %v402_v53  ;;  %v404_v5 = vmax.f32 %v372_v55, 0.0  ;;  %v275_v9 = vmul.f32 %v598_v0, %v236_v52  ;;  %v373_v10 = vadd.f32 %v341_v56, %v309_v59  ;;  %v312_v12 = vadd.f32 %v616_v2, %v273_v62  ;;  %v241_v27 = vld [vmem:[%s604_s23 + $0x90] sm:$0xff]  ;;  %v242_v32 = vld [vmem:[%s604_s23 + $0x98] sm:$0xff]  ;;  %v243_v33 = vld [vmem:[%s604_s23 + $0xa0] sm:$0xff] }
  0x1d   : > { %v374_v11 = vadd.f32 %v342_v57, %v310_v60  ;;  %v313_v13 = vadd.f32 %v616_v2, %v274_v63  ;;  %435 = vst [vmem:[%s646_s5 + $0x30] sm:$0xff] %v403_v4  ;;  %v375_v15 = vadd.f32 %v343_v61, %v311_v6  ;;  %v276_v17 = vmul.f32 %v598_v0, %v237_v1  ;;  %v244_v38 = vld [vmem:[%s604_s23 + $0xa8] sm:$0xff]  ;;  %v349_v42 = vld [vmem:[%s610_s26 + $0x80] sm:$0xff]  ;;  %v351_v47 = vld [vmem:[%s610_s26 + $0x90] sm:$0xff] }
  0x1e   : > { %436 = vst [vmem:[%s646_s5 + $0x38] sm:$0xff] %v404_v5  ;;  %v314_v16 = vadd.f32 %v616_v2, %v275_v9  ;;  %v277_v18 = vmul.f32 %v598_v0, %v238_v3  ;;  %v405_v21 = vmax.f32 %v373_v10, 0.0  ;;  %v376_v23 = vadd.f32 %v344_v7, %v312_v12  ;;  %v350_v43 = vld [vmem:[%s610_s26 + $0x88] sm:$0xff]  ;;  %v245_v50 = vld [vmem:[%s604_s23 + $0xb0] sm:$0xff]  ;;  %v246_v51 = vld [vmem:[%s604_s23 + $0xb8] sm:$0xff] }
  0x1f   : > { %v406_v22 = vmax.f32 %v374_v11, 0.0  ;;  %v377_v24 = vadd.f32 %v345_v8, %v313_v13  ;;  %v407_v28 = vmax.f32 %v375_v15, 0.0  ;;  %v315_v30 = vadd.f32 %v616_v2, %v276_v17  ;;  %v352_v55 = vld [vmem:[%s610_s26 + $0x98] sm:$0xff]  ;;  %v353_v56 = vld [vmem:[%s610_s26 + $0xa0] sm:$0xff]  ;;  %v354_v62 = vld [vmem:[%s610_s26 + $0xa8] sm:$0xff] }
  0x20   : > { %v378_v29 = vadd.f32 %v346_v14, %v314_v16  ;;  %v316_v31 = vadd.f32 %v616_v2, %v277_v18  ;;  %437 = vst [vmem:[%s646_s5 + $0x40] sm:$0xff] %v405_v21  ;;  %v408_v34 = vmax.f32 %v376_v23, 0.0  ;;  %v278_v36 = vmul.f32 %v598_v0, %v239_v19  ;;  %v247_v5 = vld [vmem:[%s604_s23 + $0xc0] sm:$0xff]  ;;  %v248_v6 = vld [vmem:[%s604_s23 + $0xc8] sm:$0xff]  ;;  %v355_v11 = vld [vmem:[%s610_s26 + $0xb0] sm:$0xff] }
  0x21   : > { %438 = vst [vmem:[%s646_s5 + $0x48] sm:$0xff] %v406_v22  ;;  %v409_v35 = vmax.f32 %v377_v24, 0.0  ;;  %v279_v37 = vmul.f32 %v598_v0, %v240_v20  ;;  %439 = vst [vmem:[%s646_s5 + $0x50] sm:$0xff] %v407_v28  ;;  %v379_v40 = vadd.f32 %v347_v25, %v315_v30  ;;  %v280_v44 = vmul.f32 %v598_v0, %v241_v27  ;;  %v356_v12 = vld [vmem:[%s610_s26 + $0xb8] sm:$0xff]  ;;  %v249_v13 = vld [vmem:[%s604_s23 + $0xd0] sm:$0xff] }
  0x22   : > { %v410_v39 = vmax.f32 %v378_v29, 0.0  ;;  %v380_v41 = vadd.f32 %v348_v26, %v316_v31  ;;  %440 = vst [vmem:[%s646_s5 + $0x58] sm:$0xff] %v408_v34  ;;  %v317_v45 = vadd.f32 %v616_v2, %v278_v36  ;;  %v281_v48 = vmul.f32 %v598_v0, %v242_v32  ;;  %v250_v18 = vld [vmem:[%s604_s23 + $0xd8] sm:$0xff]  ;;  %v251_v19 = vld [vmem:[%s604_s23 + $0xe0] sm:$0xff]  ;;  %v252_v24 = vld [vmem:[%s604_s23 + $0xe8] sm:$0xff] }
  0x23   : > { %441 = vst [vmem:[%s646_s5 + $0x60] sm:$0xff] %v409_v35  ;;  %v318_v46 = vadd.f32 %v616_v2, %v279_v37  ;;  %v282_v49 = vmul.f32 %v598_v0, %v243_v33  ;;  %v411_v52 = vmax.f32 %v379_v40, 0.0  ;;  %v319_v54 = vadd.f32 %v616_v2, %v280_v44  ;;  %v357_v28 = vld [vmem:[%s610_s26 + $0xc0] sm:$0xff]  ;;  %v358_v29 = vld [vmem:[%s610_s26 + $0xc8] sm:$0xff]  ;;  %v359_v33 = vld [vmem:[%s610_s26 + $0xd0] sm:$0xff] }
  0x24   : > { %442 = vst [vmem:[%s646_s5 + $0x68] sm:$0xff] %v410_v39  ;;  %v412_v53 = vmax.f32 %v380_v41, 0.0  ;;  %v283_v57 = vmul.f32 %v598_v0, %v244_v38  ;;  %v381_v58 = vadd.f32 %v349_v42, %v317_v45  ;;  %v320_v60 = vadd.f32 %v616_v2, %v281_v48  ;;  %v253_v36 = vld [vmem:[%s604_s23 + $0xf0] sm:$0xff]  ;;  %v254_v37 = vld [vmem:[%s604_s23 + $0xf8] sm:$0xff]  ;;  %v361_v42 = vld [vmem:[%s610_s26 + $0xe0] sm:$0xff] }
  0x25   : > { %v382_v59 = vadd.f32 %v350_v43, %v318_v46  ;;  %v321_v61 = vadd.f32 %v616_v2, %v282_v49  ;;  %443 = vst [vmem:[%s646_s5 + $0x70] sm:$0xff] %v411_v52  ;;  %v383_v63 = vadd.f32 %v351_v47, %v319_v54  ;;  %v284_v3 = vmul.f32 %v598_v0, %v245_v50  ;;  %v360_v41 = vld [vmem:[%s610_s26 + $0xd8] sm:$0xff]  ;;  %v362_v48 = vld [vmem:[%s610_s26 + $0xe8] sm:$0xff] }
  0x26   : > { %444 = vst [vmem:[%s646_s5 + $0x78] sm:$0xff] %v412_v53  ;;  %v322_v1 = vadd.f32 %v616_v2, %v283_v57  ;;  %v285_v4 = vmul.f32 %v598_v0, %v246_v51  ;;  %v413_v7 = vmax.f32 %v381_v58, 0.0  ;;  %v384_v9 = vadd.f32 %v352_v55, %v320_v60  ;;  %v363_v57 = vld [vmem:[%s610_s26 + $0xf0] sm:$0xff]  ;;  %v364_v58 = vld [vmem:[%s610_s26 + $0xf8] sm:$0xff] }
  0x27   : > { %v414_v8 = vmax.f32 %v382_v59, 0.0  ;;  %v385_v10 = vadd.f32 %v353_v56, %v321_v61  ;;  %v415_v14 = vmax.f32 %v383_v63, 0.0  ;;  %v323_v16 = vadd.f32 %v616_v2, %v284_v3 }
  0x28   : > { %v386_v15 = vadd.f32 %v354_v62, %v322_v1  ;;  %v324_v17 = vadd.f32 %v616_v2, %v285_v4  ;;  %445 = vst [vmem:[%s646_s5 + $0x80] sm:$0xff] %v413_v7  ;;  %v416_v20 = vmax.f32 %v384_v9, 0.0  ;;  %v286_v22 = vmul.f32 %v598_v0, %v247_v5 }
  0x29   : > { %446 = vst [vmem:[%s646_s5 + $0x88] sm:$0xff] %v414_v8  ;;  %v417_v21 = vmax.f32 %v385_v10, 0.0  ;;  %v287_v23 = vmul.f32 %v598_v0, %v248_v6  ;;  %447 = vst [vmem:[%s646_s5 + $0x90] sm:$0xff] %v415_v14  ;;  %v387_v26 = vadd.f32 %v355_v11, %v323_v16  ;;  %v288_v30 = vmul.f32 %v598_v0, %v249_v13 }
  0x2a   : > { %v418_v25 = vmax.f32 %v386_v15, 0.0  ;;  %v388_v27 = vadd.f32 %v356_v12, %v324_v17  ;;  %448 = vst [vmem:[%s646_s5 + $0x98] sm:$0xff] %v416_v20  ;;  %v325_v31 = vadd.f32 %v616_v2, %v286_v22  ;;  %v289_v34 = vmul.f32 %v598_v0, %v250_v18 }
  0x2b   : > { %449 = vst [vmem:[%s646_s5 + $0xa0] sm:$0xff] %v417_v21  ;;  %v326_v32 = vadd.f32 %v616_v2, %v287_v23  ;;  %v290_v35 = vmul.f32 %v598_v0, %v251_v19  ;;  %v419_v38 = vmax.f32 %v387_v26, 0.0  ;;  %v327_v40 = vadd.f32 %v616_v2, %v288_v30 }
  0x2c   : > { %450 = vst [vmem:[%s646_s5 + $0xa8] sm:$0xff] %v418_v25  ;;  %v420_v39 = vmax.f32 %v388_v27, 0.0  ;;  %v291_v43 = vmul.f32 %v598_v0, %v252_v24  ;;  %v389_v44 = vadd.f32 %v357_v28, %v325_v31  ;;  %v328_v46 = vadd.f32 %v616_v2, %v289_v34 }
  0x2d   : > { %v390_v45 = vadd.f32 %v358_v29, %v326_v32  ;;  %v329_v47 = vadd.f32 %v616_v2, %v290_v35  ;;  %451 = vst [vmem:[%s646_s5 + $0xb0] sm:$0xff] %v419_v38  ;;  %v391_v49 = vadd.f32 %v359_v33, %v327_v40  ;;  %v292_v51 = vmul.f32 %v598_v0, %v253_v36 }
  0x2e   : > { %452 = vst [vmem:[%s646_s5 + $0xb8] sm:$0xff] %v420_v39  ;;  %v330_v50 = vadd.f32 %v616_v2, %v291_v43  ;;  %v293_v52 = vmul.f32 %v598_v0, %v254_v37  ;;  %v421_v53 = vmax.f32 %v389_v44, 0.0  ;;  %v392_v55 = vadd.f32 %v360_v41, %v328_v46 }
  0x2f   : > { %v422_v54 = vmax.f32 %v390_v45, 0.0  ;;  %v393_v56 = vadd.f32 %v361_v42, %v329_v47  ;;  %v423_v59 = vmax.f32 %v391_v49, 0.0  ;;  %v331_v61 = vadd.f32 %v616_v2, %v292_v51 }
  0x30   : > { %v394_v60 = vadd.f32 %v362_v48, %v330_v50  ;;  %v332_v62 = vadd.f32 %v616_v2, %v293_v52  ;;  %453 = vst [vmem:[%s646_s5 + $0xc0] sm:$0xff] %v421_v53  ;;  %v424_v0 = vmax.f32 %v392_v55, 0.0 }
  0x31   : > { %454 = vst [vmem:[%s646_s5 + $0xc8] sm:$0xff] %v422_v54  ;;  %v425_v63 = vmax.f32 %v393_v56, 0.0  ;;  %455 = vst [vmem:[%s646_s5 + $0xd0] sm:$0xff] %v423_v59  ;;  %v395_v3 = vadd.f32 %v363_v57, %v331_v61 }
  0x32   : > { %v426_v1 = vmax.f32 %v394_v60, 0.0  ;;  %v396_v4 = vadd.f32 %v364_v58, %v332_v62  ;;  %456 = vst [vmem:[%s646_s5 + $0xd8] sm:$0xff] %v424_v0 }
  0x33   : > { %457 = vst [vmem:[%s646_s5 + $0xe0] sm:$0xff] %v425_v63  ;;  %v427_v5 = vmax.f32 %v395_v3, 0.0 }
  0x34   : > { %458 = vst [vmem:[%s646_s5 + $0xe8] sm:$0xff] %v426_v1  ;;  %v428_v6 = vmax.f32 %v396_v4, 0.0 }
  0x35   : > { %459 = vst [vmem:[%s646_s5 + $0xf0] sm:$0xff] %v427_v5 }
  0x36   : > { %460 = vst [vmem:[%s646_s5 + $0xf8] sm:$0xff] %v428_v6 }
  0x37 PF: > { %s14_s15 = sadd.s32 1, %s558_s15  }
  0x38   : > { %p11_p4 = scmp.ge.s32.totalorder %s14_s15, 4  }
  0x3a   :  { %13 = sbr.rel (!%p11_p4) target bundleno = 1 (0x1), region = 69 }

</bundles_post_ra>
